<compile_context>
chip_gen: v6e
topology: v6e:2x2x1
jax: 0.10.0
libtpu: 0.0.40
codegen_flags: <defaults>
</compile_context>

<pallas_src>
import math

import jax
import jax.numpy as jnp
from jax.experimental import pallas as pl
from jax.experimental.pallas import tpu as pltpu

WINDOW_SIZE = 11
SIGMA = 1.5
PAD = WINDOW_SIZE // 2
C1 = 0.01 ** 2
C2 = 0.03 ** 2

_SUBLANE = 8   # TPU sublane tile
_LANE = 128    # TPU lane tile


def _gaussian_1d(window_size, sigma):
    g = [math.exp(-((x - window_size // 2) ** 2) / (2.0 * sigma ** 2))
         for x in range(window_size)]
    s = sum(g)
    return [v / s for v in g]


_W1D = _gaussian_1d(WINDOW_SIZE, SIGMA)          # baked-in weights
_W2D = [[a * b for b in _W1D] for a in _W1D]     # used by the JAX reference only


def _band_matrix(n):
    """(n, n) banded matrix G with G[i, j] = w1d[i - j + PAD] for |i - j| <= PAD.

    Multiplying by G reproduces the 11-tap 'same' convolution (zero padding)
    exactly: rows/cols outside [0, n) simply have no band entry.
    """
    idx = jnp.arange(n)
    d = idx[:, None] - idx[None, :]
    w1d = jnp.asarray(_W1D, dtype=jnp.float32)
    taps = jnp.clip(d + PAD, 0, WINDOW_SIZE - 1)
    return jnp.where(jnp.abs(d) <= PAD, w1d[taps], 0.0).astype(jnp.float32)


def _make_ssim_sum_kernel(P, H, W):
    f32 = jnp.float32

    def kernel(x1_ref, x2_ref, gh_ref, gv_ref, out_ref):
        x1 = x1_ref[...].astype(f32)
        x2 = x2_ref[...].astype(f32)
        gh = gh_ref[...]                                     # (W, W)
        # Hoisted once per step (broadcast_in_dim is not CSE'd by JAX).
        gv_b = jnp.broadcast_to(gv_ref[...][None, :, :], (P, H, H))

        def blur(t):                                         # (P,H,W) -> (P,H,W)
            # Horizontal pass: one (P*H, W) x (W, W) MXU matmul; the zero
            # "same" padding is folded into the banded matrix.
            th = jnp.dot(t.reshape(P * H, W), gh,
                         preferred_element_type=f32).reshape(P, H, W)
            # Vertical pass: batched (H, H) x (H, W) MXU matmul per plane.
            return jnp.einsum("pkh,phw->pkw", gv_b, th,
                              preferred_element_type=f32)

        # Streamed product -> blur: only x1, x2 and the 5 blurred maps stay live.
        mu1 = blur(x1)
        mu2 = blur(x2)
        s11 = blur(x1 * x1)
        s22 = blur(x2 * x2)
        s12 = blur(x1 * x2)

        mu1_sq = mu1 * mu1
        mu2_sq = mu2 * mu2
        mu1_mu2 = mu1 * mu2
        sigma1_sq = s11 - mu1_sq
        sigma2_sq = s22 - mu2_sq
        sigma12 = s12 - mu1_mu2

        num = (2.0 * mu1_mu2 + C1) * (2.0 * sigma12 + C2)
        den = (mu1_sq + mu2_sq + C1) * (sigma1_sq + sigma2_sq + C2)
        ssim_map = num / den                                 # (P, H, W)

        # Fused mean: one partial sum per plane, lane-dense (P, 128) store.
        plane_sum = jnp.sum(jnp.sum(ssim_map, axis=2), axis=1, keepdims=True)
        out_ref[...] = jnp.broadcast_to(plane_sum, out_ref.shape)

    return kernel


def _plane_tiling(bc, H, W, in_itemsize):
    """Pick planes-per-block P from the chip's actual VMEM capacity."""
    try:
        vmem_cap = int(pltpu.get_tpu_info().vmem_capacity_bytes)
    except Exception:                    # conservative fallback = v7x per-core
        vmem_cap = 64 * 1024 * 1024
    budget = (vmem_cap * 2) // 5         # ~40%: headroom for double buffering

    per_plane = (2 * 2 * H * W * in_itemsize   # two inputs, double-buffered
                 + 12 * H * W * 4              # live f32 maps / blur temps
                 + H * H * 4)                  # this plane's slice of gv_b
    fixed = 2 * 4 * (W * W + H * H)            # Gh / Gv blocks

    p = max(_SUBLANE, ((budget - fixed) // per_plane) // _SUBLANE * _SUBLANE)
    bc_ceil = -(-bc // _SUBLANE) * _SUBLANE
    p = min(p, bc_ceil)
    # Keep >= 2 grid steps when there is enough work, so the ("parallel",)
    # axis can shard across v7x's two TensorCores and the pipeline has >1 step.
    if bc_ceil >= 2 * _SUBLANE:
        p = min(p, max(_SUBLANE, (bc_ceil // 2) // _SUBLANE * _SUBLANE))
    vmem_need = p * per_plane + fixed
    return p, vmem_need, vmem_cap


def ssim_forward(img1, img2, size_average=True):
    """Equivalent of SSIM.forward(img1, img2) for NCHW inputs."""
    B, C, H, W = img1.shape
    BC = B * C

    # Keep floating inputs in their native dtype (bf16 halves HBM traffic);
    # only integer inputs are promoted here.
    if not jnp.issubdtype(img1.dtype, jnp.floating):
        img1 = img1.astype(jnp.float32)
    x1 = img1.reshape(BC, H, W)
    x2 = img2.astype(img1.dtype).reshape(BC, H, W)

    P, vmem_need, vmem_cap = _plane_tiling(BC, H, W, jnp.dtype(x1.dtype).itemsize)
    bc_pad = -(-BC // P) * P
    if bc_pad != BC:
        # TODO(synk): replace with an in-kernel valid-plane mask (scalar
        # prefetch) to avoid this extra HBM copy for a ragged last block.
        x1 = jnp.pad(x1, ((0, bc_pad - BC), (0, 0), (0, 0)))
        x2 = jnp.pad(x2, ((0, bc_pad - BC), (0, 0), (0, 0)))
    n_blocks = bc_pad // P

    # TODO(synk): very large planes (>= tens of MiB per plane) additionally need
    # row tiling with a 2*PAD halo to stay inside VMEM; not needed for SR crops.

    gh = _band_matrix(W)                               # horizontal blur matrix
    gv = _band_matrix(H)                               # vertical blur matrix

    params = {"dimension_semantics": ("parallel",)}
    if vmem_need > 12 * 1024 * 1024:
        # actual need + pipelining margin, capped well below physical VMEM
        params["vmem_limit_bytes"] = int(min(max(vmem_need * 3 // 2, 32 << 20),
                                             (vmem_cap * 3) // 4))

    plane_sums = pl.pallas_call(
        _make_ssim_sum_kernel(P, H, W),
        out_shape=jax.ShapeDtypeStruct((bc_pad, _LANE), jnp.float32),
        grid_spec=pltpu.PrefetchScalarGridSpec(
            num_scalar_prefetch=0,
            grid=(n_blocks,),
            in_specs=[
                pl.BlockSpec((P, H, W), lambda g: (g, 0, 0)),
                pl.BlockSpec((P, H, W), lambda g: (g, 0, 0)),
                pl.BlockSpec((W, W), lambda g: (0, 0)),    # Gh, fetched once
                pl.BlockSpec((H, H), lambda g: (0, 0)),    # Gv, fetched once
            ],
            out_specs=pl.BlockSpec((P, _LANE), lambda g: (g, 0)),
        ),
        compiler_params=pltpu.CompilerParams(**params),
    )(x1, x2, gh, gv)

    sums = plane_sums[:BC, 0]                          # per-plane ssim_map sums
    if size_average:
        return jnp.sum(sums) / (BC * H * W)            # == ssim_map.mean()
    return jnp.sum(sums.reshape(B, C), axis=1) / (C * H * W)  # mean([1,2,3])


def _ssim_reference(img1, img2, size_average=True):
    """Pure-JAX reference (lax depthwise conv) for a numerical sanity check."""
    B, C, H, W = img1.shape
    w2d = jnp.asarray(_W2D, dtype=jnp.float32)
    window = jnp.broadcast_to(w2d[None, None], (C, 1, WINDOW_SIZE, WINDOW_SIZE))

    def conv(x):
        return jax.lax.conv_general_dilated(
            x, window, window_strides=(1, 1), padding=[(PAD, PAD), (PAD, PAD)],
            dimension_numbers=("NCHW", "OIHW", "NCHW"), feature_group_count=C,
            precision=jax.lax.Precision.HIGHEST)

    img1 = img1.astype(jnp.float32)
    img2 = img2.astype(jnp.float32)
    mu1, mu2 = conv(img1), conv(img2)
    mu1_sq, mu2_sq, mu1_mu2 = mu1 * mu1, mu2 * mu2, mu1 * mu2
    sigma1_sq = conv(img1 * img1) - mu1_sq
    sigma2_sq = conv(img2 * img2) - mu2_sq
    sigma12 = conv(img1 * img2) - mu1_mu2
    ssim_map = ((2 * mu1_mu2 + C1) * (2 * sigma12 + C2)) / (
        (mu1_sq + mu2_sq + C1) * (sigma1_sq + sigma2_sq + C2))
    if size_average:
        return jnp.mean(ssim_map)
    return jnp.mean(ssim_map, axis=(1, 2, 3))


if __name__ == "__main__":
    key = jax.random.PRNGKey(0)
    k1, k2 = jax.random.split(key)
    B, C, H, W = 2, 4, 16, 16
    img1 = jax.random.uniform(k1, (B, C, H, W), dtype=jnp.float32)
    img2 = jax.random.uniform(k2, (B, C, H, W), dtype=jnp.float32)

    # Tolerance: the kernel's banded-matrix blur is mathematically identical to
    # the conv reference; differences are only MXU f32-matmul rounding.
    out = jax.block_until_ready(ssim_forward(img1, img2, size_average=True))
    ref = jax.block_until_ready(_ssim_reference(img1, img2, size_average=True))
    assert jnp.allclose(out, ref, rtol=1e-3, atol=1e-4), (out, ref)

    out_b = jax.block_until_ready(ssim_forward(img1, img2, size_average=False))
    ref_b = jax.block_until_ready(_ssim_reference(img1, img2, size_average=False))
    assert jnp.allclose(out_b, ref_b, rtol=1e-3, atol=1e-4), (out_b, ref_b)

    print("KERNEL_OK")
</pallas_src>

<mosaic_0001>
module attributes {stable_mosaic.version = 11 : i64} {
  func.func @kernel(%arg0: i32, %arg1: memref<8x16x16xf32, #tpu.memory_space<vmem>>, %arg2: memref<8x16x16xf32, #tpu.memory_space<vmem>>, %arg3: memref<16x16xf32, #tpu.memory_space<vmem>>, %arg4: memref<16x16xf32, #tpu.memory_space<vmem>>, %arg5: memref<8x128xf32, #tpu.memory_space<vmem>>) attributes {dimension_semantics = [#tpu.dimension_semantics<parallel>], iteration_bounds = array<i64: 1>, scalar_prefetch = 0 : i64, scratch_operands = 0 : i64, tpu.core_type = #tpu.core_type<tc>, window_params = [{transform_indices = @transform_0, window_bounds = array<i64: 8, 16, 16>}, {transform_indices = @transform_1, window_bounds = array<i64: 8, 16, 16>}, {pipeline_mode = #tpu.pipeline_mode<synchronous>, transform_indices = @transform_2, window_bounds = array<i64: 16, 16>}, {pipeline_mode = #tpu.pipeline_mode<synchronous>, transform_indices = @transform_3, window_bounds = array<i64: 16, 16>}, {transform_indices = @transform_4, window_bounds = array<i64: 8, 128>}]} {
    %c0 = arith.constant 0 : index
    %c0_0 = arith.constant 0 : index
    %c0_1 = arith.constant 0 : index
    %0 = vector.load %arg1[%c0, %c0_0, %c0_1] : memref<8x16x16xf32, #tpu.memory_space<vmem>>, vector<8x16x16xf32>
    %c0_2 = arith.constant 0 : index
    %c0_3 = arith.constant 0 : index
    %c0_4 = arith.constant 0 : index
    %1 = vector.load %arg2[%c0_2, %c0_3, %c0_4] : memref<8x16x16xf32, #tpu.memory_space<vmem>>, vector<8x16x16xf32>
    %c0_5 = arith.constant 0 : index
    %c0_6 = arith.constant 0 : index
    %2 = vector.load %arg3[%c0_5, %c0_6] : memref<16x16xf32, #tpu.memory_space<vmem>>, vector<16x16xf32>
    %c0_7 = arith.constant 0 : index
    %c0_8 = arith.constant 0 : index
    %3 = vector.load %arg4[%c0_7, %c0_8] : memref<16x16xf32, #tpu.memory_space<vmem>>, vector<16x16xf32>
    %4 = vector.shape_cast %3 : vector<16x16xf32> to vector<1x16x16xf32>
    %5 = vector.shape_cast %4 : vector<1x16x16xf32> to vector<1x16x16xf32>
    %6 = vector.broadcast %5 : vector<1x16x16xf32> to vector<8x16x16xf32>
    %7 = vector.shape_cast %0 : vector<8x16x16xf32> to vector<128x16xf32>
    %cst = arith.constant dense<0.000000e+00> : vector<128x16xf32>
    %8 = tpu.matmul %7, %2, %cst {dimension_numbers = #tpu.dot_dimension_numbers<[1], [0], [0], [1], [0, 0, 1, 1], [], []>} : vector<128x16xf32>, vector<16x16xf32>, vector<128x16xf32> -> vector<128x16xf32>
    %9 = vector.shape_cast %8 : vector<128x16xf32> to vector<8x16x16xf32>
    "tpu.trace_start"() <{level = 10 : i32, message = "pkh,phw->pkw"}> : () -> ()
    %cst_9 = arith.constant dense<0.000000e+00> : vector<8x16x16xf32>
    %10 = tpu.matmul %6, %9, %cst_9 {dimension_numbers = #tpu.dot_dimension_numbers<[2], [1], [1], [2], [0, 0, 0, 1, 1, 2], [0], [0]>} : vector<8x16x16xf32>, vector<8x16x16xf32>, vector<8x16x16xf32> -> vector<8x16x16xf32>
    "tpu.trace_stop"() : () -> ()
    %11 = vector.shape_cast %1 : vector<8x16x16xf32> to vector<128x16xf32>
    %cst_10 = arith.constant dense<0.000000e+00> : vector<128x16xf32>
    %12 = tpu.matmul %11, %2, %cst_10 {dimension_numbers = #tpu.dot_dimension_numbers<[1], [0], [0], [1], [0, 0, 1, 1], [], []>} : vector<128x16xf32>, vector<16x16xf32>, vector<128x16xf32> -> vector<128x16xf32>
    %13 = vector.shape_cast %12 : vector<128x16xf32> to vector<8x16x16xf32>
    "tpu.trace_start"() <{level = 10 : i32, message = "pkh,phw->pkw"}> : () -> ()
    %cst_11 = arith.constant dense<0.000000e+00> : vector<8x16x16xf32>
    %14 = tpu.matmul %6, %13, %cst_11 {dimension_numbers = #tpu.dot_dimension_numbers<[2], [1], [1], [2], [0, 0, 0, 1, 1, 2], [0], [0]>} : vector<8x16x16xf32>, vector<8x16x16xf32>, vector<8x16x16xf32> -> vector<8x16x16xf32>
    "tpu.trace_stop"() : () -> ()
    %15 = arith.mulf %0, %0 : vector<8x16x16xf32>
    %16 = vector.shape_cast %15 : vector<8x16x16xf32> to vector<128x16xf32>
    %cst_12 = arith.constant dense<0.000000e+00> : vector<128x16xf32>
    %17 = tpu.matmul %16, %2, %cst_12 {dimension_numbers = #tpu.dot_dimension_numbers<[1], [0], [0], [1], [0, 0, 1, 1], [], []>} : vector<128x16xf32>, vector<16x16xf32>, vector<128x16xf32> -> vector<128x16xf32>
    %18 = vector.shape_cast %17 : vector<128x16xf32> to vector<8x16x16xf32>
    "tpu.trace_start"() <{level = 10 : i32, message = "pkh,phw->pkw"}> : () -> ()
    %cst_13 = arith.constant dense<0.000000e+00> : vector<8x16x16xf32>
    %19 = tpu.matmul %6, %18, %cst_13 {dimension_numbers = #tpu.dot_dimension_numbers<[2], [1], [1], [2], [0, 0, 0, 1, 1, 2], [0], [0]>} : vector<8x16x16xf32>, vector<8x16x16xf32>, vector<8x16x16xf32> -> vector<8x16x16xf32>
    "tpu.trace_stop"() : () -> ()
    %20 = arith.mulf %1, %1 : vector<8x16x16xf32>
    %21 = vector.shape_cast %20 : vector<8x16x16xf32> to vector<128x16xf32>
    %cst_14 = arith.constant dense<0.000000e+00> : vector<128x16xf32>
    %22 = tpu.matmul %21, %2, %cst_14 {dimension_numbers = #tpu.dot_dimension_numbers<[1], [0], [0], [1], [0, 0, 1, 1], [], []>} : vector<128x16xf32>, vector<16x16xf32>, vector<128x16xf32> -> vector<128x16xf32>
    %23 = vector.shape_cast %22 : vector<128x16xf32> to vector<8x16x16xf32>
    "tpu.trace_start"() <{level = 10 : i32, message = "pkh,phw->pkw"}> : () -> ()
    %cst_15 = arith.constant dense<0.000000e+00> : vector<8x16x16xf32>
    %24 = tpu.matmul %6, %23, %cst_15 {dimension_numbers = #tpu.dot_dimension_numbers<[2], [1], [1], [2], [0, 0, 0, 1, 1, 2], [0], [0]>} : vector<8x16x16xf32>, vector<8x16x16xf32>, vector<8x16x16xf32> -> vector<8x16x16xf32>
    "tpu.trace_stop"() : () -> ()
    %25 = arith.mulf %0, %1 : vector<8x16x16xf32>
    %26 = vector.shape_cast %25 : vector<8x16x16xf32> to vector<128x16xf32>
    %cst_16 = arith.constant dense<0.000000e+00> : vector<128x16xf32>
    %27 = tpu.matmul %26, %2, %cst_16 {dimension_numbers = #tpu.dot_dimension_numbers<[1], [0], [0], [1], [0, 0, 1, 1], [], []>} : vector<128x16xf32>, vector<16x16xf32>, vector<128x16xf32> -> vector<128x16xf32>
    %28 = vector.shape_cast %27 : vector<128x16xf32> to vector<8x16x16xf32>
    "tpu.trace_start"() <{level = 10 : i32, message = "pkh,phw->pkw"}> : () -> ()
    %cst_17 = arith.constant dense<0.000000e+00> : vector<8x16x16xf32>
    %29 = tpu.matmul %6, %28, %cst_17 {dimension_numbers = #tpu.dot_dimension_numbers<[2], [1], [1], [2], [0, 0, 0, 1, 1, 2], [0], [0]>} : vector<8x16x16xf32>, vector<8x16x16xf32>, vector<8x16x16xf32> -> vector<8x16x16xf32>
    "tpu.trace_stop"() : () -> ()
    %30 = arith.mulf %10, %10 : vector<8x16x16xf32>
    %31 = arith.mulf %14, %14 : vector<8x16x16xf32>
    %32 = arith.mulf %10, %14 : vector<8x16x16xf32>
    %33 = arith.subf %19, %30 : vector<8x16x16xf32>
    %34 = arith.subf %24, %31 : vector<8x16x16xf32>
    %35 = arith.subf %29, %32 : vector<8x16x16xf32>
    %cst_18 = arith.constant 2.000000e+00 : f32
    %36 = vector.broadcast %cst_18 : f32 to vector<8x16x16xf32>
    %37 = arith.mulf %36, %32 : vector<8x16x16xf32>
    %cst_19 = arith.constant 9.99999974E-5 : f32
    %38 = vector.broadcast %cst_19 : f32 to vector<8x16x16xf32>
    %39 = arith.addf %37, %38 : vector<8x16x16xf32>
    %cst_20 = arith.constant 2.000000e+00 : f32
    %40 = vector.broadcast %cst_20 : f32 to vector<8x16x16xf32>
    %41 = arith.mulf %40, %35 : vector<8x16x16xf32>
    %cst_21 = arith.constant 8.99999984E-4 : f32
    %42 = vector.broadcast %cst_21 : f32 to vector<8x16x16xf32>
    %43 = arith.addf %41, %42 : vector<8x16x16xf32>
    %44 = arith.mulf %39, %43 : vector<8x16x16xf32>
    %45 = arith.addf %30, %31 : vector<8x16x16xf32>
    %cst_22 = arith.constant 9.99999974E-5 : f32
    %46 = vector.broadcast %cst_22 : f32 to vector<8x16x16xf32>
    %47 = arith.addf %45, %46 : vector<8x16x16xf32>
    %48 = arith.addf %33, %34 : vector<8x16x16xf32>
    %cst_23 = arith.constant 8.99999984E-4 : f32
    %49 = vector.broadcast %cst_23 : f32 to vector<8x16x16xf32>
    %50 = arith.addf %48, %49 : vector<8x16x16xf32>
    %51 = arith.mulf %47, %50 : vector<8x16x16xf32>
    %52 = arith.divf %44, %51 : vector<8x16x16xf32>
    %cst_24 = arith.constant dense<0.000000e+00> : vector<8x16xf32>
    %53 = vector.multi_reduction <add>, %52, %cst_24 [2] : vector<8x16x16xf32> to vector<8x16xf32>
    %cst_25 = arith.constant dense<0.000000e+00> : vector<8xf32>
    %54 = vector.multi_reduction <add>, %53, %cst_25 [1] : vector<8x16xf32> to vector<8xf32>
    %55 = vector.shape_cast %54 : vector<8xf32> to vector<8x1xf32>
    %56 = vector.shape_cast %55 : vector<8x1xf32> to vector<8x1xf32>
    %57 = vector.broadcast %56 : vector<8x1xf32> to vector<8x128xf32>
    %c0_26 = arith.constant 0 : index
    %c0_27 = arith.constant 0 : index
    %58 = vector.load %arg5[%c0_26, %c0_27] : memref<8x128xf32, #tpu.memory_space<vmem>>, vector<8x128xf32>
    tpu.vector_store %arg5[%c0_26, %c0_27], %57 {strides = array<i32>} : memref<8x128xf32, #tpu.memory_space<vmem>>, vector<8x128xf32>,
    return
  }
  func.func @transform_0(%arg0: i32) -> (i32, i32, i32) {
    %c0_i32 = arith.constant 0 : i32
    %c0_i32_0 = arith.constant 0 : i32
    %c0_i32_1 = arith.constant 0 : i32
    return %arg0, %c0_i32, %c0_i32_0 : i32, i32, i32
  }
  func.func @transform_1(%arg0: i32) -> (i32, i32, i32) {
    %c0_i32 = arith.constant 0 : i32
    %c0_i32_0 = arith.constant 0 : i32
    %c0_i32_1 = arith.constant 0 : i32
    return %arg0, %c0_i32, %c0_i32_0 : i32, i32, i32
  }
  func.func @transform_2(%arg0: i32) -> (i32, i32) {
    %c0_i32 = arith.constant 0 : i32
    %c0_i32_0 = arith.constant 0 : i32
    %c0_i32_1 = arith.constant 0 : i32
    return %c0_i32, %c0_i32_0 : i32, i32
  }
  func.func @transform_3(%arg0: i32) -> (i32, i32) {
    %c0_i32 = arith.constant 0 : i32
    %c0_i32_0 = arith.constant 0 : i32
    %c0_i32_1 = arith.constant 0 : i32
    return %c0_i32, %c0_i32_0 : i32, i32
  }
  func.func @transform_4(%arg0: i32) -> (i32, i32) {
    %c0_i32 = arith.constant 0 : i32
    %c0_i32_0 = arith.constant 0 : i32
    return %arg0, %c0_i32 : i32, i32
  }
}

</mosaic_0001>

<bundles_post_ra>
// kernel: tpu_custom_call.1
= control target key start
LH: loop header
LB: loop body
LE: loop exit
PB: predicated region body
PF: predicated region fallthrough
CT: control target
= control target key end

     0   :  { %9 = vsyncpa [#allocation3], 0  ;;  %s6503_s0 = inlined_call_operand.hbm [shape: f32[8,16,16], index: 0, kind: input, shape index: {}]   ;;  %s6504_s1 = inlined_call_operand.hbm [shape: f32[8,16,16], index: 1, kind: input, shape index: {}]   ;;  %s6505_s2 = inlined_call_operand.hbm [shape: f32[16,16], index: 2, kind: input, shape index: {}]   ;;  %s6506_s3 = inlined_call_operand.hbm [shape: f32[16,16], index: 3, kind: input, shape index: {}]   ;;  %s6507_s4 = inlined_call_operand.hbm [shape: f32[8,128], index: 4, kind: output, shape index: {}]  }
   0x1   :  { %10 = vsyncpa [#allocation6], 0 }
   0x2   :  { %11 = vsyncpa [#allocation9], 0 }
   0x3   :  { %12 = vsyncpa [#allocation4], 0  ;;  %s5570_s15 = smov [#allocation5]   ;;  %s5571_s17 = smov [#allocation2]  }
   0x4   :  { %s30_s16 = sshll.u32 %s5570_s15, 4  ;;  %s18_s18 = sshll.u32 %s5571_s17, 4  ;;  %s31_s16 = int_to_ptr.vmem [resolvable:$true] %s30_s16  ;;  %s19_s18 = int_to_ptr.vmem [resolvable:$true] %s18_s18 }
   0x5   :  { %s5470_s19 = scalar_lea.vmem %s31_s16, 2048  ;;  %p5475_p1 = scmp.lt.s32.totalorder %s31_s16, %s31_s16 }
   0x6   :  { %p5471_p0 = scmp.ne.s32.totalorder %s31_s16, %s5470_s19  ;;  %p5476_p2 = scmp.lt.s32.totalorder %s5470_s19, %s5470_s19 }
   0x8   :  { %p5477_p3 = por %p5476_p2, %p5475_p1 }
   0xa   :  { %p5478_p4 = pnand %p5477_p3, %p5471_p0 }
   0xc   :  { %5481 = shalt.err (!%p5478_p4)
}
   0xd   :  { %s5572_s20 = smov 128   ;;  %s5573_s21 = smov 8  }
   0xe   :  { %36 = dma.hbm_to_vmem [thread:$0]  %s6504_s1, 2048, %s31_s16, [#allocation6], %s5572_s20, %s5572_s20, %s5573_s21  }
   0xf   :  { %s5490_s24 = scalar_lea.vmem %s19_s18, 2048  ;;  %p5495_p6 = scmp.lt.s32.totalorder %s19_s18, %s19_s18 }
  0x10   :  { %p5491_p5 = scmp.ne.s32.totalorder %s19_s18, %s5490_s24  ;;  %p5496_p7 = scmp.lt.s32.totalorder %s5490_s24, %s5490_s24 }
  0x12   :  { %p5497_p8 = por %p5496_p7, %p5495_p6 }
  0x14   :  { %p5498_p9 = pnand %p5497_p8, %p5491_p5 }
  0x16   :  { %5501 = shalt.err (!%p5498_p9)
}
  0x17   :  { %24 = dma.hbm_to_vmem [thread:$0]  %s6503_s0, 2048, %s19_s18, [#allocation3], %s5572_s20, %s5572_s20, %s5573_s21  }
  0x18   :  { %s5574_s27 = smov [#allocation7]   ;;  %s5575_s29 = smov [#allocation8]  }
  0x19   :  { %s42_s28 = sshll.u32 %s5574_s27, 4  ;;  %s54_s30 = sshll.u32 %s5575_s29, 4  ;;  %s43_s28 = int_to_ptr.vmem [resolvable:$true] %s42_s28  ;;  %s55_s30 = int_to_ptr.vmem [resolvable:$true] %s54_s30 }
  0x1a   :  { %s5510_s1 = scalar_lea.vmem %s43_s28, 256  ;;  %p5515_p11 = scmp.lt.s32.totalorder %s43_s28, %s43_s28 }
  0x1b   :  { %p5511_p10 = scmp.ne.s32.totalorder %s43_s28, %s5510_s1  ;;  %p5516_p12 = scmp.lt.s32.totalorder %s5510_s1, %s5510_s1 }
  0x1d   :  { %p5517_p13 = por %p5516_p12, %p5515_p11 }
  0x1f   :  { %p5518_p0 = pnand %p5517_p13, %p5511_p10 }
  0x21   :  { %5521 = shalt.err (!%p5518_p0)
}
  0x22   :  { %48 = dma.hbm_to_vmem [thread:$0]  %s6505_s2, 256, %s43_s28, [#allocation6], %s5572_s20, %s5572_s20, %s5573_s21  }
  0x23   :  { %s5530_s0 = scalar_lea.vmem %s55_s30, 256  ;;  %p5535_p2 = scmp.lt.s32.totalorder %s55_s30, %s55_s30 }
  0x24   :  { %p5531_p1 = scmp.ne.s32.totalorder %s55_s30, %s5530_s0  ;;  %p5536_p3 = scmp.lt.s32.totalorder %s5530_s0, %s5530_s0 }
  0x26   :  { %p5537_p4 = por %p5536_p3, %p5535_p2 }
  0x28   :  { %p5538_p5 = pnand %p5537_p4, %p5531_p1 }
  0x2a   :  { %5541 = shalt.err (!%p5538_p5)
}
  0x2b   :  { %60 = dma.hbm_to_vmem [thread:$0]  %s6506_s3, 256, %s55_s30, [#allocation9], %s5572_s20, %s5572_s20, %s5573_s21  }
  0x2c   :  { %5562 = dma.done.wait [#allocation3], 2048  }
  0x2d   :  { %5563 = vsyncadd [#allocation3], 4294965248 }
  0x2e   :  { %5564 = dma.done.wait [#allocation6], 2304  }
  0x2f   :  { %5565 = vsyncadd [#allocation6], 4294964992 }
  0x30   :  { %5566 = dma.done.wait [#allocation9], 256  }
  0x31   :  { %5567 = vsyncadd [#allocation9], 4294967040  ;;  %vm109_vm0 = vcmask 130048   ;;  %v5626_v0 = vld [vmem:[#allocation7 + $0x8] sm:$0xff]  ;;  %v5628_v1 = vld [vmem:[#allocation7] sm:$0xff]  ;;  %vm4492_vm1 = vcmask 130112  }
  0x32   :  { %v5630_v2 = vld [vmem:[#allocation2] sm:$0xff]  ;;  %5003 = vmatprep.subr.mxu0 %v5626_v0  ;;  %v5635_v3 = vld [vmem:[#allocation2 + $0x8] sm:$0xff]  ;;  %v5645_v6 = vld [vmem:[#allocation2 + $0x10] sm:$0xff]  ;;  %vm4557_vm2 = vcmask 1041409   ;;  %vm4559_vm3 = vcmask 1042434   ;;  %vm4561_vm4 = vcmask 1043459  }
  0x33   :  { %5007 = vmatprep.mubr.msk.f32.mxu0 %vm109_vm0, %v5630_v2  ;;  %v5637_v4 = vld [vmem:[#allocation5 + $0x8] sm:$0xff]  ;;  %5004 = vmatpush3.msra.mxu0 %v5626_v0  ;;  %v5651_v7 = vld [vmem:[#allocation2 + $0x18] sm:$0xff]  ;;  %v5656_v8 = vld [vmem:[#allocation2 + $0x20] sm:$0xff]  ;;  %v1702_v50 = vmul.f32 %v5630_v2, %v5630_v2  ;;  %v1703_v51 = vmul.f32 %v5635_v3, %v5635_v3  ;;  %v1704_v52 = vmul.f32 %v5645_v6, %v5645_v6  ;;  %vm4563_vm5 = vcmask 1044484   ;;  %s5576_s2 = smov [#allocation10]  }
  0x34   :  { %v5642_v5 = vmul.f32 %v5637_v4, %v5635_v3  ;;  %5005 = vmatprep.subr.mxu0 %v5628_v1  ;;  %v5658_v9 = vld [vmem:[#allocation2 + $0x28] sm:$0xff]  ;;  %v5660_v10 = vld [vmem:[#allocation5] sm:$0xff]  ;;  %v5662_v11 = vld [vmem:[#allocation2 + $0x30] sm:$0xff]  ;;  %v1705_v53 = vmul.f32 %v5651_v7, %v5651_v7  ;;  %v1706_v54 = vmul.f32 %v5656_v8, %v5656_v8  ;;  %vm4565_vm6 = vcmask 1045509   ;;  %s4582_s3 = sshll.u32 %s5576_s2, 4  ;;  %s4583_s3 = int_to_ptr.vmem [resolvable:$true] %s4582_s3 }
  0x35   :  { %5006 = vmatpush3.msra.mxu0 %v5628_v1  ;;  %v5664_v12 = vld [vmem:[#allocation2 + $0x38] sm:$0xff]  ;;  %v5669_v13 = vmul.f32 %v5660_v10, %v5630_v2  ;;  %v5671_v14 = vld [vmem:[#allocation5 + $0x10] sm:$0xff]  ;;  %v5675_v16 = vld [vmem:[#allocation2 + $0x40] sm:$0xff]  ;;  %v1707_v56 = vmul.f32 %v5658_v9, %v5658_v9  ;;  %v1708_v57 = vmul.f32 %v5662_v11, %v5662_v11  ;;  %vm4567_vm7 = vcmask 1046534   ;;  %s5542_s9 = scalar_lea.vmem %s4583_s3, 128  ;;  %p5547_p7 = scmp.lt.s32.totalorder %s4583_s3, %s4583_s3 }
  0x36   :  { %5008 = vmatmul.mubr.msk.f32.vlgmr.msra.gmra.mxu0 %vm109_vm0, %v5635_v3  ;;  %5087 = vmatprep.subr.mxu0 %v5626_v0  ;;  %v5673_v15 = vld [vmem:[#allocation5 + $0x18] sm:$0xff]  ;;  %v5677_v17 = vld [vmem:[#allocation2 + $0x48] sm:$0xff]  ;;  %v5682_v18 = vmul.f32 %v5671_v14, %v5645_v6  ;;  %v5688_v20 = vld [vmem:[#allocation5 + $0x20] sm:$0xff]  ;;  %v1709_v58 = vmul.f32 %v5664_v12, %v5664_v12  ;;  %v1710_v59 = vmul.f32 %v5675_v16, %v5675_v16  ;;  %vm4569_vm8 = vcmask 1047559   ;;  %p5543_p6 = scmp.ne.s32.totalorder %s4583_s3, %s5542_s9  ;;  %p5548_p8 = scmp.lt.s32.totalorder %s5542_s9, %s5542_s9 }
  0x37   :  { %5088 = vmatpush3.msra.mxu0 %v5626_v0  ;;  %5010 = vmatprep.mubr.msk.f32.mxu0 %vm109_vm0, %v5645_v6  ;;  %v5686_v19 = vmul.f32 %v5673_v15, %v5651_v7  ;;  %v5690_v21 = vld [vmem:[#allocation5 + $0x28] sm:$0xff]  ;;  %v5694_v22 = vld [vmem:[#allocation2 + $0x50] sm:$0xff]  ;;  %v5696_v23 = vld [vmem:[#allocation2 + $0x58] sm:$0xff]  ;;  %v5701_v24 = vmul.f32 %v5688_v20, %v5656_v8  ;;  %v1711_v60 = vmul.f32 %v5677_v17, %v5677_v17 }
  0x38   :  { %5089 = vmatprep.subr.mxu0 %v5628_v1  ;;  %v5705_v25 = vmul.f32 %v5690_v21, %v5658_v9  ;;  %v5707_v26 = vld [vmem:[#allocation5 + $0x30] sm:$0xff]  ;;  %v5709_v27 = vld [vmem:[#allocation5 + $0x38] sm:$0xff]  ;;  %v5713_v28 = vld [vmem:[#allocation2 + $0x60] sm:$0xff]  ;;  %v1712_v61 = vmul.f32 %v5694_v22, %v5694_v22  ;;  %v1713_v62 = vmul.f32 %v5696_v23, %v5696_v23  ;;  %p5549_p9 = por %p5548_p8, %p5547_p7 }
  0x39   :  { %5090 = vmatpush3.msra.mxu0 %v5628_v1  ;;  %v5717_v29 = vmul.f32 %v5707_v26, %v5662_v11  ;;  %v5721_v30 = vmul.f32 %v5709_v27, %v5664_v12  ;;  %v5723_v31 = vld [vmem:[#allocation5 + $0x40] sm:$0xff]  ;;  %v5725_v32 = vld [vmem:[#allocation5 + $0x48] sm:$0xff]  ;;  %v5737_v36 = vld [vmem:[#allocation5 + $0x50] sm:$0xff]  ;;  %v1714_v63 = vmul.f32 %v5713_v28, %v5713_v28 }
  0x3a   :  { %5011 = vmatmul.mubr.msk.f32.gmra.mxu0 %vm109_vm0, %v5651_v7  ;;  %5171 = vmatprep.subr.mxu0 %v5626_v0  ;;  %v5727_v33 = vld [vmem:[#allocation2 + $0x68] sm:$0xff]  ;;  %v5731_v34 = vmul.f32 %v5723_v31, %v5675_v16  ;;  %v5735_v35 = vmul.f32 %v5725_v32, %v5677_v17  ;;  %v5739_v37 = vld [vmem:[#allocation5 + $0x58] sm:$0xff]  ;;  %v5741_v38 = vld [vmem:[#allocation2 + $0x70] sm:$0xff]  ;;  %v5745_v39 = vmul.f32 %v5737_v36, %v5694_v22  ;;  %p5550_p10 = pnand %p5549_p9, %p5543_p6 }
  0x3b   :  { %5013 = vmatprep.mubr.msk.f32.mxu0 %vm109_vm0, %v5656_v8  ;;  %v5749_v40 = vmul.f32 %v5739_v37, %v5696_v23  ;;  %v5751_v41 = vld [vmem:[#allocation5 + $0x60] sm:$0xff]  ;;  %v5753_v42 = vld [vmem:[#allocation5 + $0x68] sm:$0xff]  ;;  %v5757_v43 = vld [vmem:[#allocation2 + $0x78] sm:$0xff]  ;;  %v1715_v2 = vmul.f32 %v5727_v33, %v5727_v33  ;;  %v1716_v3 = vmul.f32 %v5741_v38, %v5741_v38  ;;  %v2511_v7 = vmul.f32 %v5660_v10, %v5660_v10 }
  0x3c   :  { %v5761_v44 = vmul.f32 %v5751_v41, %v5713_v28  ;;  %v5765_v45 = vmul.f32 %v5753_v42, %v5727_v33  ;;  %v5767_v46 = vld [vmem:[#allocation5 + $0x70] sm:$0xff]  ;;  %v5769_v47 = vld [vmem:[#allocation5 + $0x78] sm:$0xff]  ;;  %v1717_v6 = vmul.f32 %v5757_v43, %v5757_v43  ;;  %v2512_v8 = vmul.f32 %v5637_v4, %v5637_v4 }
  0x3d   :  { %v5775_v48 = vmul.f32 %v5767_v46, %v5741_v38  ;;  %v5779_v49 = vmul.f32 %v5769_v47, %v5757_v43  ;;  %v5851_v55 = vld [vmem:[#allocation8] sm:$0xff] }
  0x3e   :  { %5014 = vmatmul.mubr.msk.f32.gmra.mxu0 %vm109_vm0, %v5658_v9  ;;  %5035 = vmatprep.mubr.msk.f32.mxu1 %vm109_vm0, %v5851_v55  ;;  %v2513_v9 = vmul.f32 %v5671_v14, %v5671_v14 }
  0x3f   :  { %5016 = vmatprep.mubr.msk.f32.mxu0 %vm109_vm0, %v5662_v11  ;;  %v2514_v11 = vmul.f32 %v5673_v15, %v5673_v15 }
  0x42   :  { %5017 = vmatmul.mubr.msk.f32.gmra.mxu0 %vm109_vm0, %v5664_v12  ;;  %v2517_v12 = vmul.f32 %v5707_v26, %v5707_v26 }
  0x43   :  { %5019 = vmatprep.mubr.msk.f32.mxu0 %vm109_vm0, %v5675_v16  ;;  %v2522_v16 = vmul.f32 %v5739_v37, %v5739_v37 }
  0x46   :  { %5020 = vmatmul.mubr.msk.f32.gmra.mxu0 %vm109_vm0, %v5677_v17  ;;  %v2523_v17 = vmul.f32 %v5751_v41, %v5751_v41 }
  0x47   :  { %5022 = vmatprep.mubr.msk.f32.mxu0 %vm109_vm0, %v5694_v22  ;;  %v2526_v22 = vmul.f32 %v5769_v47, %v5769_v47 }
  0x4a   :  { %5023 = vmatmul.mubr.msk.f32.gmra.mxu0 %vm109_vm0, %v5696_v23 }
  0x4b   :  { %5025 = vmatprep.mubr.msk.f32.mxu0 %vm109_vm0, %v5713_v28 }
  0x4e   :  { %5026 = vmatmul.mubr.msk.f32.gmra.mxu0 %vm109_vm0, %v5727_v33 }
  0x4f   :  { %5028 = vmatprep.mubr.msk.f32.mxu0 %vm109_vm0, %v5741_v38 }
  0x52   :  { %5029 = vmatmul.mubr.msk.f32.gmra.mxu0 %vm109_vm0, %v5757_v43 }
  0x53   :  { %5091 = vmatprep.mubr.msk.f32.mxu0 %vm109_vm0, %v5660_v10  ;;  %v2515_v10 = vmul.f32 %v5688_v20, %v5688_v20 }
  0x56   :  { %5092 = vmatmul.mubr.msk.f32.vlgmr.msra.gmra.mxu0 %vm109_vm0, %v5637_v4  ;;  %v2516_v4 = vmul.f32 %v5690_v21, %v5690_v21 }
  0x57   :  { %5172 = vmatpush3.msra.mxu0 %v5626_v0  ;;  %5094 = vmatprep.mubr.msk.f32.mxu0 %vm109_vm0, %v5671_v14  ;;  %v2518_v14 = vmul.f32 %v5709_v27, %v5709_v27 }
  0x58   :  { %5173 = vmatprep.subr.mxu0 %v5628_v1 }
  0x59   :  { %5174 = vmatpush3.msra.mxu0 %v5628_v1 }
  0x5a   :  { %5095 = vmatmul.mubr.msk.f32.gmra.mxu0 %vm109_vm0, %v5673_v15  ;;  %5255 = vmatprep.subr.mxu0 %v5626_v0  ;;  %v2521_v15 = vmul.f32 %v5737_v36, %v5737_v36 }
  0x5b   :  { %5097 = vmatprep.mubr.msk.f32.mxu0 %vm109_vm0, %v5688_v20  ;;  %v2524_v20 = vmul.f32 %v5753_v42, %v5753_v42 }
  0x5e   :  { %5098 = vmatmul.mubr.msk.f32.gmra.mxu0 %vm109_vm0, %v5690_v21  ;;  %v2525_v21 = vmul.f32 %v5767_v46, %v5767_v46 }
  0x5f   :  { %5100 = vmatprep.mubr.msk.f32.mxu0 %vm109_vm0, %v5707_v26 }
  0x62   :  { %5101 = vmatmul.mubr.msk.f32.gmra.mxu0 %vm109_vm0, %v5709_v27 }
  0x63   :  { %5103 = vmatprep.mubr.msk.f32.mxu0 %vm109_vm0, %v5723_v31 }
  0x66   :  { %5104 = vmatmul.mubr.msk.f32.gmra.mxu0 %vm109_vm0, %v5725_v32 }
  0x67   :  { %5106 = vmatprep.mubr.msk.f32.mxu0 %vm109_vm0, %v5737_v36 }
  0x6a   :  { %5107 = vmatmul.mubr.msk.f32.gmra.mxu0 %vm109_vm0, %v5739_v37 }
  0x6b   :  { %5109 = vmatprep.mubr.msk.f32.mxu0 %vm109_vm0, %v5751_v41 }
  0x6e   :  { %5110 = vmatmul.mubr.msk.f32.gmra.mxu0 %vm109_vm0, %v5753_v42 }
  0x6f   :  { %5112 = vmatprep.mubr.msk.f32.mxu0 %vm109_vm0, %v5767_v46 }
  0x72   :  { %5113 = vmatmul.mubr.msk.f32.gmra.mxu0 %vm109_vm0, %v5769_v47 }
  0x73   :  { %5175 = vmatprep.mubr.msk.f32.mxu0 %vm109_vm0, %v1702_v50 }
  0x76   :  { %5176 = vmatmul.mubr.msk.f32.vlgmr.msra.gmra.mxu0 %vm109_vm0, %v1703_v51 }
  0x77   :  { %5256 = vmatpush3.msra.mxu0 %v5626_v0  ;;  %5178 = vmatprep.mubr.msk.f32.mxu0 %vm109_vm0, %v1704_v52 }
  0x78   :  { %5257 = vmatprep.subr.mxu0 %v5628_v1 }
  0x79   :  { %5258 = vmatpush3.msra.mxu0 %v5628_v1 }
  0x7a   :  { %5179 = vmatmul.mubr.msk.f32.gmra.mxu0 %vm109_vm0, %v1705_v53  ;;  %5339 = vmatprep.subr.mxu0 %v5626_v0 }
  0x7b   :  { %5181 = vmatprep.mubr.msk.f32.mxu0 %vm109_vm0, %v1706_v54 }
  0x7e   :  { %5182 = vmatmul.mubr.msk.f32.gmra.mxu0 %vm109_vm0, %v1707_v56 }
  0x7f   :  { %5184 = vmatprep.mubr.msk.f32.mxu0 %vm109_vm0, %v1708_v57 }
  0x82   :  { %5185 = vmatmul.mubr.msk.f32.gmra.mxu0 %vm109_vm0, %v1709_v58 }
  0x83   :  { %5187 = vmatprep.mubr.msk.f32.mxu0 %vm109_vm0, %v1710_v59 }
  0x86   :  { %5188 = vmatmul.mubr.msk.f32.gmra.mxu0 %vm109_vm0, %v1711_v60 }
  0x87   :  { %5190 = vmatprep.mubr.msk.f32.mxu0 %vm109_vm0, %v1712_v61 }
  0x8a   :  { %5191 = vmatmul.mubr.msk.f32.gmra.mxu0 %vm109_vm0, %v1713_v62 }
  0x8b   :  { %5193 = vmatprep.mubr.msk.f32.mxu0 %vm109_vm0, %v1714_v63 }
  0x8e   :  { %5194 = vmatmul.mubr.msk.f32.gmra.mxu0 %vm109_vm0, %v1715_v2 }
  0x8f   :  { %5196 = vmatprep.mubr.msk.f32.mxu0 %vm109_vm0, %v1716_v3 }
  0x92   :  { %5197 = vmatmul.mubr.msk.f32.gmra.mxu0 %vm109_vm0, %v1717_v6 }
  0x93   :  { %5259 = vmatprep.mubr.msk.f32.mxu0 %vm109_vm0, %v2511_v7 }
  0x96   :  { %5260 = vmatmul.mubr.msk.f32.vlgmr.msra.gmra.mxu0 %vm109_vm0, %v2512_v8 }
  0x97   :  { %5340 = vmatpush3.msra.mxu0 %v5626_v0  ;;  %5262 = vmatprep.mubr.msk.f32.mxu0 %vm109_vm0, %v2513_v9  ;;  %v2519_v0 = vmul.f32 %v5723_v31, %v5723_v31 }
  0x98   :  { %5341 = vmatprep.subr.mxu0 %v5628_v1 }
  0x99   :  { %5342 = vmatpush3.msra.mxu0 %v5628_v1  ;;  %v2520_v1 = vmul.f32 %v5725_v32, %v5725_v32 }
  0x9a   :  { %5263 = vmatmul.mubr.msk.f32.gmra.mxu0 %vm109_vm0, %v2514_v11 }
  0x9b   :  { %5265 = vmatprep.mubr.msk.f32.mxu0 %vm109_vm0, %v2515_v10 }
  0x9e   :  { %5266 = vmatmul.mubr.msk.f32.gmra.mxu0 %vm109_vm0, %v2516_v4 }
  0x9f   :  { %5268 = vmatprep.mubr.msk.f32.mxu0 %vm109_vm0, %v2517_v12 }
  0xa2   :  { %5269 = vmatmul.mubr.msk.f32.gmra.mxu0 %vm109_vm0, %v2518_v14 }
  0xa3   :  { %5271 = vmatprep.mubr.msk.f32.mxu0 %vm109_vm0, %v2519_v0 }
  0xa6   :  { %5272 = vmatmul.mubr.msk.f32.gmra.mxu0 %vm109_vm0, %v2520_v1 }
  0xa7   :  { %5274 = vmatprep.mubr.msk.f32.mxu0 %vm109_vm0, %v2521_v15 }
  0xaa   :  { %5275 = vmatmul.mubr.msk.f32.gmra.mxu0 %vm109_vm0, %v2522_v16 }
  0xab   :  { %5277 = vmatprep.mubr.msk.f32.mxu0 %vm109_vm0, %v2523_v17 }
  0xae   :  { %5278 = vmatmul.mubr.msk.f32.gmra.mxu0 %vm109_vm0, %v2524_v20 }
  0xaf   :  { %5280 = vmatprep.mubr.msk.f32.mxu0 %vm109_vm0, %v2525_v21 }
  0xb2   :  { %5281 = vmatmul.mubr.msk.f32.gmra.mxu0 %vm109_vm0, %v2526_v22 }
  0xb3   :  { %5343 = vmatprep.mubr.msk.f32.mxu0 %vm109_vm0, %v5669_v13 }
  0xb6   :  { %5344 = vmatmul.mubr.msk.f32.vlgmr.msra.gmra.mxu0 %vm109_vm0, %v5642_v5 }
  0xb7   :  { %5346 = vmatprep.mubr.msk.f32.mxu0 %vm109_vm0, %v5682_v18  ;;  %v5974_v18 = vld [vmem:[#allocation8 + $0x8] sm:$0xff] }
  0xba   :  { %5347 = vmatmul.mubr.msk.f32.gmra.mxu0 %vm109_vm0, %v5686_v19 }
  0xbb   :  { %5349 = vmatprep.mubr.msk.f32.mxu0 %vm109_vm0, %v5701_v24 }
  0xbe   :  { %5350 = vmatmul.mubr.msk.f32.gmra.mxu0 %vm109_vm0, %v5705_v25 }
  0xbf   :  { %5352 = vmatprep.mubr.msk.f32.mxu0 %vm109_vm0, %v5717_v29 }
  0xc2   :  { %5353 = vmatmul.mubr.msk.f32.gmra.mxu0 %vm109_vm0, %v5721_v30 }
  0xc3   :  { %5355 = vmatprep.mubr.msk.f32.mxu0 %vm109_vm0, %v5731_v34 }
  0xc6   :  { %5356 = vmatmul.mubr.msk.f32.gmra.mxu0 %vm109_vm0, %v5735_v35 }
  0xc7   :  { %5358 = vmatprep.mubr.msk.f32.mxu0 %vm109_vm0, %v5745_v39 }
  0xca   :  { %5359 = vmatmul.mubr.msk.f32.gmra.mxu0 %vm109_vm0, %v5749_v40 }
  0xcb   :  { %5361 = vmatprep.mubr.msk.f32.mxu0 %vm109_vm0, %v5761_v44 }
  0xce   :  { %5362 = vmatmul.mubr.msk.f32.gmra.mxu0 %vm109_vm0, %v5765_v45 }
  0xcf   :  { %5364 = vmatprep.mubr.msk.f32.mxu0 %vm109_vm0, %v5775_v48 }
  0xd2   :  { %5365 = vmatmul.mubr.msk.f32.gmra.mxu0 %vm109_vm0, %v5779_v49 }
  0xf6   :  { %v5009_v5 = vpop.f32.mrf.mxu0 }
  0xf7   :  { %5031 = vmatprep.subr.mxu1 %v5009_v5 }
  0xf8   :  { %v224_v13 = vpop.f32.mrf.mxu0  ;;  %5032 = vmatpush3.msra.mxu1 %v5009_v5 }
  0xf9   :  { %5033 = vmatprep.subr.mxu1 %v224_v13 }
  0xfa   :  { %v5012_v19 = vpop.f32.mrf.mxu0  ;;  %5034 = vmatpush3.msra.mxu1 %v224_v13 }
  0xfb   :  { %5036 = vmatmul.mubr.msk.f32.vlgmr.msra.gmra.mxu1 %vm109_vm0, %v5974_v18  ;;  %5038 = vmatprep.subr.mxu1 %v5012_v19 }
  0xfc   :  { %v234_v23 = vpop.f32.mrf.mxu0  ;;  %5039 = vmatpush3.msra.mxu1 %v5012_v19  ;;  %5042 = vmatprep.mubr.msk.f32.mxu1 %vm109_vm0, %v5851_v55 }
  0xfd   :  { %5040 = vmatprep.subr.mxu1 %v234_v23 }
  0xfe   :  { %v5015_v24 = vpop.f32.mrf.mxu0  ;;  %5041 = vmatpush3.msra.mxu1 %v234_v23 }
  0xff   :  { %5043 = vmatmul.mubr.msk.f32.vlgmr.msra.gmra.mxu1 %vm109_vm0, %v5974_v18  ;;  %5045 = vmatprep.subr.mxu1 %v5015_v24 }
 0x100   :  { %v244_v25 = vpop.f32.mrf.mxu0  ;;  %5046 = vmatpush3.msra.mxu1 %v5015_v24  ;;  %5049 = vmatprep.mubr.msk.f32.mxu1 %vm109_vm0, %v5851_v55 }
 0x101   :  { %5047 = vmatprep.subr.mxu1 %v244_v25 }
 0x102   :  { %v5018_v26 = vpop.f32.mrf.mxu0  ;;  %5048 = vmatpush3.msra.mxu1 %v244_v25 }
 0x103   :  { %5050 = vmatmul.mubr.msk.f32.vlgmr.msra.gmra.mxu1 %vm109_vm0, %v5974_v18  ;;  %5052 = vmatprep.subr.mxu1 %v5018_v26 }
 0x104   :  { %v254_v27 = vpop.f32.mrf.mxu0  ;;  %5053 = vmatpush3.msra.mxu1 %v5018_v26  ;;  %5056 = vmatprep.mubr.msk.f32.mxu1 %vm109_vm0, %v5851_v55 }
 0x105   :  { %5054 = vmatprep.subr.mxu1 %v254_v27 }
 0x106   :  { %v5021_v28 = vpop.f32.mrf.mxu0  ;;  %5055 = vmatpush3.msra.mxu1 %v254_v27 }
 0x107   :  { %5057 = vmatmul.mubr.msk.f32.vlgmr.msra.gmra.mxu1 %vm109_vm0, %v5974_v18  ;;  %5059 = vmatprep.subr.mxu1 %v5021_v28 }
 0x108   :  { %v264_v29 = vpop.f32.mrf.mxu0  ;;  %5060 = vmatpush3.msra.mxu1 %v5021_v28  ;;  %5063 = vmatprep.mubr.msk.f32.mxu1 %vm109_vm0, %v5851_v55 }
 0x109   :  { %5061 = vmatprep.subr.mxu1 %v264_v29 }
 0x10a   :  { %v5024_v30 = vpop.f32.mrf.mxu0  ;;  %5062 = vmatpush3.msra.mxu1 %v264_v29 }
 0x10b   :  { %5064 = vmatmul.mubr.msk.f32.vlgmr.msra.gmra.mxu1 %vm109_vm0, %v5974_v18  ;;  %5066 = vmatprep.subr.mxu1 %v5024_v30 }
 0x10c   :  { %v274_v31 = vpop.f32.mrf.mxu0  ;;  %5067 = vmatpush3.msra.mxu1 %v5024_v30  ;;  %5070 = vmatprep.mubr.msk.f32.mxu1 %vm109_vm0, %v5851_v55 }
 0x10d   :  { %5068 = vmatprep.subr.mxu1 %v274_v31 }
 0x10e   :  { %v5027_v32 = vpop.f32.mrf.mxu0  ;;  %5069 = vmatpush3.msra.mxu1 %v274_v31 }
 0x10f   :  { %5071 = vmatmul.mubr.msk.f32.vlgmr.msra.gmra.mxu1 %vm109_vm0, %v5974_v18  ;;  %5073 = vmatprep.subr.mxu1 %v5027_v32 }
 0x110   :  { %v284_v33 = vpop.f32.mrf.mxu0  ;;  %5074 = vmatpush3.msra.mxu1 %v5027_v32  ;;  %5077 = vmatprep.mubr.msk.f32.mxu1 %vm109_vm0, %v5851_v55 }
 0x111   :  { %5075 = vmatprep.subr.mxu1 %v284_v33 }
 0x112   :  { %v5030_v34 = vpop.f32.mrf.mxu0  ;;  %5076 = vmatpush3.msra.mxu1 %v284_v33 }
 0x113   :  { %5078 = vmatmul.mubr.msk.f32.vlgmr.msra.gmra.mxu1 %vm109_vm0, %v5974_v18  ;;  %5080 = vmatprep.subr.mxu1 %v5030_v34 }
 0x114   :  { %v294_v35 = vpop.f32.mrf.mxu0  ;;  %5081 = vmatpush3.msra.mxu1 %v5030_v34  ;;  %5084 = vmatprep.mubr.msk.f32.mxu1 %vm109_vm0, %v5851_v55 }
 0x115   :  { %5082 = vmatprep.subr.mxu1 %v294_v35 }
 0x116   :  { %5083 = vmatpush3.msra.mxu1 %v294_v35  ;;  %v5093_v36 = vpop.f32.mrf.mxu0 }
 0x117   :  { %5085 = vmatmul.mubr.msk.f32.vlgmr.msra.gmra.mxu1 %vm109_vm0, %v5974_v18  ;;  %5115 = vmatprep.subr.mxu1 %v5093_v36 }
 0x118   :  { %v1023_v37 = vpop.f32.mrf.mxu0  ;;  %5116 = vmatpush3.msra.mxu1 %v5093_v36  ;;  %5119 = vmatprep.mubr.msk.f32.mxu1 %vm109_vm0, %v5851_v55 }
 0x119   :  { %5117 = vmatprep.subr.mxu1 %v1023_v37 }
 0x11a   :  { %v5096_v38 = vpop.f32.mrf.mxu0  ;;  %5118 = vmatpush3.msra.mxu1 %v1023_v37 }
 0x11b   :  { %5120 = vmatmul.mubr.msk.f32.vlgmr.msra.gmra.mxu1 %vm109_vm0, %v5974_v18  ;;  %5122 = vmatprep.subr.mxu1 %v5096_v38 }
 0x11c   :  { %v1033_v39 = vpop.f32.mrf.mxu0  ;;  %5123 = vmatpush3.msra.mxu1 %v5096_v38  ;;  %5126 = vmatprep.mubr.msk.f32.mxu1 %vm109_vm0, %v5851_v55 }
 0x11d   :  { %5124 = vmatprep.subr.mxu1 %v1033_v39 }
 0x11e   :  { %v5099_v40 = vpop.f32.mrf.mxu0  ;;  %5125 = vmatpush3.msra.mxu1 %v1033_v39 }
 0x11f   :  { %5127 = vmatmul.mubr.msk.f32.vlgmr.msra.gmra.mxu1 %vm109_vm0, %v5974_v18  ;;  %5129 = vmatprep.subr.mxu1 %v5099_v40 }
 0x120   :  { %v1043_v41 = vpop.f32.mrf.mxu0  ;;  %5130 = vmatpush3.msra.mxu1 %v5099_v40  ;;  %5133 = vmatprep.mubr.msk.f32.mxu1 %vm109_vm0, %v5851_v55 }
 0x121   :  { %5131 = vmatprep.subr.mxu1 %v1043_v41 }
 0x122   :  { %v5102_v42 = vpop.f32.mrf.mxu0  ;;  %5132 = vmatpush3.msra.mxu1 %v1043_v41 }
 0x123   :  { %5134 = vmatmul.mubr.msk.f32.vlgmr.msra.gmra.mxu1 %vm109_vm0, %v5974_v18  ;;  %5136 = vmatprep.subr.mxu1 %v5102_v42 }
 0x124   :  { %v1053_v43 = vpop.f32.mrf.mxu0  ;;  %5137 = vmatpush3.msra.mxu1 %v5102_v42  ;;  %5140 = vmatprep.mubr.msk.f32.mxu1 %vm109_vm0, %v5851_v55 }
 0x125   :  { %5138 = vmatprep.subr.mxu1 %v1053_v43 }
 0x126   :  { %v5105_v44 = vpop.f32.mrf.mxu0  ;;  %5139 = vmatpush3.msra.mxu1 %v1053_v43 }
 0x127   :  { %5141 = vmatmul.mubr.msk.f32.vlgmr.msra.gmra.mxu1 %vm109_vm0, %v5974_v18  ;;  %5143 = vmatprep.subr.mxu1 %v5105_v44 }
 0x128   :  { %v1063_v45 = vpop.f32.mrf.mxu0  ;;  %5144 = vmatpush3.msra.mxu1 %v5105_v44  ;;  %5147 = vmatprep.mubr.msk.f32.mxu1 %vm109_vm0, %v5851_v55 }
 0x129   :  { %5145 = vmatprep.subr.mxu1 %v1063_v45 }
 0x12a   :  { %v5108_v46 = vpop.f32.mrf.mxu0  ;;  %5146 = vmatpush3.msra.mxu1 %v1063_v45 }
 0x12b   :  { %5148 = vmatmul.mubr.msk.f32.vlgmr.msra.gmra.mxu1 %vm109_vm0, %v5974_v18  ;;  %5150 = vmatprep.subr.mxu1 %v5108_v46 }
 0x12c   :  { %v1073_v47 = vpop.f32.mrf.mxu0  ;;  %5151 = vmatpush3.msra.mxu1 %v5108_v46  ;;  %5154 = vmatprep.mubr.msk.f32.mxu1 %vm109_vm0, %v5851_v55 }
 0x12d   :  { %5152 = vmatprep.subr.mxu1 %v1073_v47 }
 0x12e   :  { %v5111_v48 = vpop.f32.mrf.mxu0  ;;  %5153 = vmatpush3.msra.mxu1 %v1073_v47 }
 0x12f   :  { %5155 = vmatmul.mubr.msk.f32.vlgmr.msra.gmra.mxu1 %vm109_vm0, %v5974_v18  ;;  %5157 = vmatprep.subr.mxu1 %v5111_v48 }
 0x130   :  { %v1083_v49 = vpop.f32.mrf.mxu0  ;;  %5158 = vmatpush3.msra.mxu1 %v5111_v48  ;;  %5161 = vmatprep.mubr.msk.f32.mxu1 %vm109_vm0, %v5851_v55 }
 0x131   :  { %5159 = vmatprep.subr.mxu1 %v1083_v49 }
 0x132   :  { %v5114_v50 = vpop.f32.mrf.mxu0  ;;  %5160 = vmatpush3.msra.mxu1 %v1083_v49 }
 0x133   :  { %5162 = vmatmul.mubr.msk.f32.vlgmr.msra.gmra.mxu1 %vm109_vm0, %v5974_v18  ;;  %5164 = vmatprep.subr.mxu1 %v5114_v50 }
 0x134   :  { %v1093_v51 = vpop.f32.mrf.mxu0  ;;  %5165 = vmatpush3.msra.mxu1 %v5114_v50  ;;  %5168 = vmatprep.mubr.msk.f32.mxu1 %vm109_vm0, %v5851_v55 }
 0x135   :  { %5166 = vmatprep.subr.mxu1 %v1093_v51 }
 0x136   :  { %5167 = vmatpush3.msra.mxu1 %v1093_v51  ;;  %v5177_v52 = vpop.f32.mrf.mxu0 }
 0x137   :  { %5169 = vmatmul.mubr.msk.f32.vlgmr.msra.gmra.mxu1 %vm109_vm0, %v5974_v18  ;;  %5199 = vmatprep.subr.mxu1 %v5177_v52 }
 0x138   :  { %v1832_v53 = vpop.f32.mrf.mxu0  ;;  %5200 = vmatpush3.msra.mxu1 %v5177_v52  ;;  %5203 = vmatprep.mubr.msk.f32.mxu1 %vm109_vm0, %v5851_v55 }
 0x139   :  { %5201 = vmatprep.subr.mxu1 %v1832_v53 }
 0x13a   :  { %v5180_v54 = vpop.f32.mrf.mxu0  ;;  %5202 = vmatpush3.msra.mxu1 %v1832_v53 }
 0x13b   :  { %5204 = vmatmul.mubr.msk.f32.vlgmr.msra.gmra.mxu1 %vm109_vm0, %v5974_v18  ;;  %5206 = vmatprep.subr.mxu1 %v5180_v54 }
 0x13c   :  { %v1842_v56 = vpop.f32.mrf.mxu0  ;;  %5207 = vmatpush3.msra.mxu1 %v5180_v54  ;;  %5210 = vmatprep.mubr.msk.f32.mxu1 %vm109_vm0, %v5851_v55 }
 0x13d   :  { %5208 = vmatprep.subr.mxu1 %v1842_v56 }
 0x13e   :  { %v5183_v57 = vpop.f32.mrf.mxu0  ;;  %5209 = vmatpush3.msra.mxu1 %v1842_v56 }
 0x13f   :  { %5211 = vmatmul.mubr.msk.f32.vlgmr.msra.gmra.mxu1 %vm109_vm0, %v5974_v18  ;;  %5213 = vmatprep.subr.mxu1 %v5183_v57 }
 0x140   :  { %v1852_v58 = vpop.f32.mrf.mxu0  ;;  %5214 = vmatpush3.msra.mxu1 %v5183_v57  ;;  %5217 = vmatprep.mubr.msk.f32.mxu1 %vm109_vm0, %v5851_v55 }
 0x141   :  { %5215 = vmatprep.subr.mxu1 %v1852_v58 }
 0x142   :  { %v5186_v59 = vpop.f32.mrf.mxu0  ;;  %5216 = vmatpush3.msra.mxu1 %v1852_v58 }
 0x143   :  { %5218 = vmatmul.mubr.msk.f32.vlgmr.msra.gmra.mxu1 %vm109_vm0, %v5974_v18  ;;  %5220 = vmatprep.subr.mxu1 %v5186_v59 }
 0x144   :  { %v1862_v60 = vpop.f32.mrf.mxu0  ;;  %5221 = vmatpush3.msra.mxu1 %v5186_v59  ;;  %5224 = vmatprep.mubr.msk.f32.mxu1 %vm109_vm0, %v5851_v55 }
 0x145   :  { %5222 = vmatprep.subr.mxu1 %v1862_v60 }
 0x146   :  { %v5189_v61 = vpop.f32.mrf.mxu0  ;;  %5223 = vmatpush3.msra.mxu1 %v1862_v60 }
 0x147   :  { %5225 = vmatmul.mubr.msk.f32.vlgmr.msra.gmra.mxu1 %vm109_vm0, %v5974_v18  ;;  %5227 = vmatprep.subr.mxu1 %v5189_v61 }
 0x148   :  { %v1872_v62 = vpop.f32.mrf.mxu0  ;;  %5228 = vmatpush3.msra.mxu1 %v5189_v61  ;;  %5231 = vmatprep.mubr.msk.f32.mxu1 %vm109_vm0, %v5851_v55 }
 0x149   :  { %5229 = vmatprep.subr.mxu1 %v1872_v62 }
 0x14a   :  { %v5192_v63 = vpop.f32.mrf.mxu0  ;;  %5230 = vmatpush3.msra.mxu1 %v1872_v62 }
 0x14b   :  { %5232 = vmatmul.mubr.msk.f32.vlgmr.msra.gmra.mxu1 %vm109_vm0, %v5974_v18  ;;  %5234 = vmatprep.subr.mxu1 %v5192_v63 }
 0x14c   :  { %v1882_v2 = vpop.f32.mrf.mxu0  ;;  %5235 = vmatpush3.msra.mxu1 %v5192_v63  ;;  %5238 = vmatprep.mubr.msk.f32.mxu1 %vm109_vm0, %v5851_v55 }
 0x14d   :  { %5236 = vmatprep.subr.mxu1 %v1882_v2 }
 0x14e   :  { %v5195_v3 = vpop.f32.mrf.mxu0  ;;  %5237 = vmatpush3.msra.mxu1 %v1882_v2 }
 0x14f   :  { %5239 = vmatmul.mubr.msk.f32.vlgmr.msra.gmra.mxu1 %vm109_vm0, %v5974_v18  ;;  %5241 = vmatprep.subr.mxu1 %v5195_v3 }
 0x150   :  { %v1892_v6 = vpop.f32.mrf.mxu0  ;;  %5242 = vmatpush3.msra.mxu1 %v5195_v3  ;;  %5245 = vmatprep.mubr.msk.f32.mxu1 %vm109_vm0, %v5851_v55 }
 0x151   :  { %5243 = vmatprep.subr.mxu1 %v1892_v6 }
 0x152   :  { %v5198_v7 = vpop.f32.mrf.mxu0  ;;  %5244 = vmatpush3.msra.mxu1 %v1892_v6 }
 0x153   :  { %5246 = vmatmul.mubr.msk.f32.vlgmr.msra.gmra.mxu1 %vm109_vm0, %v5974_v18  ;;  %5248 = vmatprep.subr.mxu1 %v5198_v7 }
 0x154   :  { %v1902_v8 = vpop.f32.mrf.mxu0  ;;  %5249 = vmatpush3.msra.mxu1 %v5198_v7  ;;  %5252 = vmatprep.mubr.msk.f32.mxu1 %vm109_vm0, %v5851_v55 }
 0x155   :  { %5250 = vmatprep.subr.mxu1 %v1902_v8 }
 0x156   :  { %5251 = vmatpush3.msra.mxu1 %v1902_v8  ;;  %v5261_v9 = vpop.f32.mrf.mxu0 }
 0x157   :  { %5253 = vmatmul.mubr.msk.f32.vlgmr.msra.gmra.mxu1 %vm109_vm0, %v5974_v18  ;;  %5283 = vmatprep.subr.mxu1 %v5261_v9 }
 0x158   :  { %v2641_v11 = vpop.f32.mrf.mxu0  ;;  %5284 = vmatpush3.msra.mxu1 %v5261_v9  ;;  %5287 = vmatprep.mubr.msk.f32.mxu1 %vm109_vm0, %v5851_v55 }
 0x159   :  { %5285 = vmatprep.subr.mxu1 %v2641_v11 }
 0x15a   :  { %v5264_v10 = vpop.f32.mrf.mxu0  ;;  %5286 = vmatpush3.msra.mxu1 %v2641_v11 }
 0x15b   :  { %5288 = vmatmul.mubr.msk.f32.vlgmr.msra.gmra.mxu1 %vm109_vm0, %v5974_v18  ;;  %5290 = vmatprep.subr.mxu1 %v5264_v10 }
 0x15c   :  { %v2651_v4 = vpop.f32.mrf.mxu0  ;;  %5291 = vmatpush3.msra.mxu1 %v5264_v10  ;;  %5294 = vmatprep.mubr.msk.f32.mxu1 %vm109_vm0, %v5851_v55 }
 0x15d   :  { %5292 = vmatprep.subr.mxu1 %v2651_v4 }
 0x15e   :  { %v5267_v12 = vpop.f32.mrf.mxu0  ;;  %5293 = vmatpush3.msra.mxu1 %v2651_v4 }
 0x15f   :  { %5295 = vmatmul.mubr.msk.f32.vlgmr.msra.gmra.mxu1 %vm109_vm0, %v5974_v18  ;;  %5297 = vmatprep.subr.mxu1 %v5267_v12 }
 0x160   :  { %v2661_v14 = vpop.f32.mrf.mxu0  ;;  %5298 = vmatpush3.msra.mxu1 %v5267_v12  ;;  %5301 = vmatprep.mubr.msk.f32.mxu1 %vm109_vm0, %v5851_v55 }
 0x161   :  { %5299 = vmatprep.subr.mxu1 %v2661_v14 }
 0x162   :  { %v5270_v0 = vpop.f32.mrf.mxu0  ;;  %5300 = vmatpush3.msra.mxu1 %v2661_v14 }
 0x163   :  { %5302 = vmatmul.mubr.msk.f32.vlgmr.msra.gmra.mxu1 %vm109_vm0, %v5974_v18  ;;  %5304 = vmatprep.subr.mxu1 %v5270_v0 }
 0x164   :  { %v2671_v1 = vpop.f32.mrf.mxu0  ;;  %5305 = vmatpush3.msra.mxu1 %v5270_v0  ;;  %5308 = vmatprep.mubr.msk.f32.mxu1 %vm109_vm0, %v5851_v55 }
 0x165   :  { %5306 = vmatprep.subr.mxu1 %v2671_v1 }
 0x166   :  { %v5273_v15 = vpop.f32.mrf.mxu0  ;;  %5307 = vmatpush3.msra.mxu1 %v2671_v1 }
 0x167   :  { %5309 = vmatmul.mubr.msk.f32.vlgmr.msra.gmra.mxu1 %vm109_vm0, %v5974_v18  ;;  %5311 = vmatprep.subr.mxu1 %v5273_v15 }
 0x168   :  { %v2681_v16 = vpop.f32.mrf.mxu0  ;;  %5312 = vmatpush3.msra.mxu1 %v5273_v15  ;;  %5315 = vmatprep.mubr.msk.f32.mxu1 %vm109_vm0, %v5851_v55 }
 0x169   :  { %5313 = vmatprep.subr.mxu1 %v2681_v16 }
 0x16a   :  { %v5276_v17 = vpop.f32.mrf.mxu0  ;;  %5314 = vmatpush3.msra.mxu1 %v2681_v16 }
 0x16b   :  { %5316 = vmatmul.mubr.msk.f32.vlgmr.msra.gmra.mxu1 %vm109_vm0, %v5974_v18  ;;  %5318 = vmatprep.subr.mxu1 %v5276_v17 }
 0x16c   :  { %v2691_v20 = vpop.f32.mrf.mxu0  ;;  %5319 = vmatpush3.msra.mxu1 %v5276_v17  ;;  %5322 = vmatprep.mubr.msk.f32.mxu1 %vm109_vm0, %v5851_v55 }
 0x16d   :  { %5320 = vmatprep.subr.mxu1 %v2691_v20 }
 0x16e   :  { %v5279_v21 = vpop.f32.mrf.mxu0  ;;  %5321 = vmatpush3.msra.mxu1 %v2691_v20 }
 0x16f   :  { %5323 = vmatmul.mubr.msk.f32.vlgmr.msra.gmra.mxu1 %vm109_vm0, %v5974_v18  ;;  %5325 = vmatprep.subr.mxu1 %v5279_v21 }
 0x170   :  { %v2701_v22 = vpop.f32.mrf.mxu0  ;;  %5326 = vmatpush3.msra.mxu1 %v5279_v21  ;;  %5329 = vmatprep.mubr.msk.f32.mxu1 %vm109_vm0, %v5851_v55 }
 0x171   :  { %5327 = vmatprep.subr.mxu1 %v2701_v22 }
 0x172   :  { %v5282_v5 = vpop.f32.mrf.mxu0  ;;  %5328 = vmatpush3.msra.mxu1 %v2701_v22 }
 0x173   :  { %5330 = vmatmul.mubr.msk.f32.vlgmr.msra.gmra.mxu1 %vm109_vm0, %v5974_v18  ;;  %5332 = vmatprep.subr.mxu1 %v5282_v5 }
 0x174   :  { %v2711_v13 = vpop.f32.mrf.mxu0  ;;  %5333 = vmatpush3.msra.mxu1 %v5282_v5  ;;  %5336 = vmatprep.mubr.msk.f32.mxu1 %vm109_vm0, %v5851_v55 }
 0x175   :  { %5334 = vmatprep.subr.mxu1 %v2711_v13 }
 0x176   :  { %5335 = vmatpush3.msra.mxu1 %v2711_v13  ;;  %v5345_v19 = vpop.f32.mrf.mxu0 }
 0x177   :  { %5337 = vmatmul.mubr.msk.f32.vlgmr.msra.gmra.mxu1 %vm109_vm0, %v5974_v18  ;;  %5367 = vmatprep.subr.mxu1 %v5345_v19 }
 0x178   :  { %v3450_v23 = vpop.f32.mrf.mxu0  ;;  %5368 = vmatpush3.msra.mxu1 %v5345_v19  ;;  %5371 = vmatprep.mubr.msk.f32.mxu1 %vm109_vm0, %v5851_v55 }
 0x179   :  { %5369 = vmatprep.subr.mxu1 %v3450_v23 }
 0x17a   :  { %v5348_v24 = vpop.f32.mrf.mxu0  ;;  %5370 = vmatpush3.msra.mxu1 %v3450_v23 }
 0x17b   :  { %5372 = vmatmul.mubr.msk.f32.vlgmr.msra.gmra.mxu1 %vm109_vm0, %v5974_v18  ;;  %5374 = vmatprep.subr.mxu1 %v5348_v24 }
 0x17c   :  { %v3460_v25 = vpop.f32.mrf.mxu0  ;;  %5375 = vmatpush3.msra.mxu1 %v5348_v24  ;;  %5378 = vmatprep.mubr.msk.f32.mxu1 %vm109_vm0, %v5851_v55 }
 0x17d   :  { %5376 = vmatprep.subr.mxu1 %v3460_v25 }
 0x17e   :  { %v5351_v26 = vpop.f32.mrf.mxu0  ;;  %5377 = vmatpush3.msra.mxu1 %v3460_v25 }
 0x17f   :  { %5379 = vmatmul.mubr.msk.f32.vlgmr.msra.gmra.mxu1 %vm109_vm0, %v5974_v18  ;;  %5381 = vmatprep.subr.mxu1 %v5351_v26 }
 0x180   :  { %v3470_v27 = vpop.f32.mrf.mxu0  ;;  %5382 = vmatpush3.msra.mxu1 %v5351_v26  ;;  %5385 = vmatprep.mubr.msk.f32.mxu1 %vm109_vm0, %v5851_v55 }
 0x181   :  { %5383 = vmatprep.subr.mxu1 %v3470_v27 }
 0x182   :  { %v5354_v28 = vpop.f32.mrf.mxu0  ;;  %5384 = vmatpush3.msra.mxu1 %v3470_v27 }
 0x183   :  { %5386 = vmatmul.mubr.msk.f32.vlgmr.msra.gmra.mxu1 %vm109_vm0, %v5974_v18  ;;  %5388 = vmatprep.subr.mxu1 %v5354_v28 }
 0x184   :  { %v3480_v29 = vpop.f32.mrf.mxu0  ;;  %5389 = vmatpush3.msra.mxu1 %v5354_v28  ;;  %5392 = vmatprep.mubr.msk.f32.mxu1 %vm109_vm0, %v5851_v55 }
 0x185   :  { %5390 = vmatprep.subr.mxu1 %v3480_v29 }
 0x186   :  { %v5357_v30 = vpop.f32.mrf.mxu0  ;;  %5391 = vmatpush3.msra.mxu1 %v3480_v29 }
 0x187   :  { %5393 = vmatmul.mubr.msk.f32.vlgmr.msra.gmra.mxu1 %vm109_vm0, %v5974_v18  ;;  %5395 = vmatprep.subr.mxu1 %v5357_v30 }
 0x188   :  { %v3490_v31 = vpop.f32.mrf.mxu0  ;;  %5396 = vmatpush3.msra.mxu1 %v5357_v30  ;;  %5399 = vmatprep.mubr.msk.f32.mxu1 %vm109_vm0, %v5851_v55 }
 0x189   :  { %5397 = vmatprep.subr.mxu1 %v3490_v31 }
 0x18a   :  { %v5360_v32 = vpop.f32.mrf.mxu0  ;;  %5398 = vmatpush3.msra.mxu1 %v3490_v31 }
 0x18b   :  { %5400 = vmatmul.mubr.msk.f32.vlgmr.msra.gmra.mxu1 %vm109_vm0, %v5974_v18  ;;  %5402 = vmatprep.subr.mxu1 %v5360_v32 }
 0x18c   :  { %v3500_v33 = vpop.f32.mrf.mxu0  ;;  %5403 = vmatpush3.msra.mxu1 %v5360_v32  ;;  %5406 = vmatprep.mubr.msk.f32.mxu1 %vm109_vm0, %v5851_v55 }
 0x18d   :  { %5404 = vmatprep.subr.mxu1 %v3500_v33 }
 0x18e   :  { %v5363_v34 = vpop.f32.mrf.mxu0  ;;  %5405 = vmatpush3.msra.mxu1 %v3500_v33 }
 0x18f   :  { %5407 = vmatmul.mubr.msk.f32.vlgmr.msra.gmra.mxu1 %vm109_vm0, %v5974_v18  ;;  %5409 = vmatprep.subr.mxu1 %v5363_v34 }
 0x190   :  { %v3510_v35 = vpop.f32.mrf.mxu0  ;;  %5410 = vmatpush3.msra.mxu1 %v5363_v34  ;;  %5413 = vmatprep.mubr.msk.f32.mxu1 %vm109_vm0, %v5851_v55 }
 0x191   :  { %5411 = vmatprep.subr.mxu1 %v3510_v35 }
 0x192   :  { %v5366_v36 = vpop.f32.mrf.mxu0  ;;  %5412 = vmatpush3.msra.mxu1 %v3510_v35 }
 0x193   :  { %5414 = vmatmul.mubr.msk.f32.vlgmr.msra.gmra.mxu1 %vm109_vm0, %v5974_v18  ;;  %5416 = vmatprep.subr.mxu1 %v5366_v36 }
 0x194   :  { %v3520_v37 = vpop.f32.mrf.mxu0  ;;  %5417 = vmatpush3.msra.mxu1 %v5366_v36  ;;  %5420 = vmatprep.mubr.msk.f32.mxu1 %vm109_vm0, %v5851_v55 }
 0x195   :  { %5418 = vmatprep.subr.mxu1 %v3520_v37 }
 0x196   :  { %5419 = vmatpush3.msra.mxu1 %v3520_v37 }
 0x197   :  { %5421 = vmatmul.mubr.msk.f32.vlgmr.msra.gmra.mxu1 %vm109_vm0, %v5974_v18 }
 0x1bb   :  { %v5037_v38 = vpop.f32.mrf.mxu1 }
 0x1bc   :  { %v6144_v53 = vmul.f32 %v5037_v38, %v5037_v38 }
 0x1bd   :  { %v375_v39 = vpop.f32.mrf.mxu1 }
 0x1be   :  { %v6150_v58 = vmul.f32 %v375_v39, %v375_v39 }
 0x1bf   :  { %v5044_v40 = vpop.f32.mrf.mxu1 }
 0x1c0   :  { %v6164_v2 = vmul.f32 %v5044_v40, %v5044_v40 }
 0x1c1   :  { %v450_v41 = vpop.f32.mrf.mxu1 }
 0x1c2   :  { %v6170_v8 = vmul.f32 %v450_v41, %v450_v41 }
 0x1c3   :  { %v5051_v42 = vpop.f32.mrf.mxu1 }
 0x1c4   :  { %v6180_v12 = vmul.f32 %v5051_v42, %v5051_v42 }
 0x1c5   :  { %v525_v43 = vpop.f32.mrf.mxu1 }
 0x1c6   :  { %v6194_v17 = vmul.f32 %v525_v43, %v525_v43 }
 0x1c7   :  { %v5058_v44 = vpop.f32.mrf.mxu1 }
 0x1c8   :  { %v6200_v5 = vmul.f32 %v5058_v44, %v5058_v44 }
 0x1c9   :  { %v600_v45 = vpop.f32.mrf.mxu1 }
 0x1ca   :  { %v6210_v25 = vmul.f32 %v600_v45, %v600_v45 }
 0x1cb   :  { %v5065_v46 = vpop.f32.mrf.mxu1 }
 0x1cc   :  { %v6224_v31 = vmul.f32 %v5065_v46, %v5065_v46 }
 0x1cd   :  { %v675_v47 = vpop.f32.mrf.mxu1 }
 0x1ce   :  { %v6230_v35 = vmul.f32 %v675_v47, %v675_v47 }
 0x1cf   :  { %v5072_v48 = vpop.f32.mrf.mxu1 }
 0x1d1   :  { %v6134_v49 = vpop.f32.mrf.mxu1 }
 0x1d3   :  { %v6136_v50 = vpop.f32.mrf.mxu1 }
 0x1d5   :  { %v6138_v55 = vpop.f32.mrf.mxu1 }
 0x1d7   :  { %v6140_v51 = vpop.f32.mrf.mxu1 }
 0x1d9   :  { %v6142_v18 = vpop.f32.mrf.mxu1 }
 0x1db   :  { %v5121_v52 = vpop.f32.mrf.mxu1 }
 0x1dc   :  { %v6146_v54 = vmul.f32 %v5121_v52, %v5121_v52  ;;  %v6148_v56 = vmul.f32 %v5121_v52, %v5037_v38 }
 0x1dd   :  { %v1168_v57 = vpop.f32.mrf.mxu1 }
 0x1de   :  { %6530 = vst [vmem:[#allocation15_spill] sm:$0xff] %v6148_v56  ;;  %v6154_v59 = vadd.f32 %v6146_v54, %v6144_v53  ;;  %v6156_v60 = vmul.f32 %v1168_v57, %v1168_v57  ;;  %v6158_v61 = vmul.f32 %v1168_v57, %v375_v39 }
 0x1df   :  { %v5128_v62 = vpop.f32.mrf.mxu1 }
 0x1e0   :  { %6531 = vst [vmem:[#allocation16_spill] sm:$0xff] %v6158_v61  ;;  %v6162_v63 = vadd.f32 %v6156_v60, %v6150_v58  ;;  %v6166_v3 = vmul.f32 %v5128_v62, %v5128_v62  ;;  %v6168_v6 = vmul.f32 %v5128_v62, %v5044_v40  ;;  %v6240_v40 = vmul.f32 %v5072_v48, %v5072_v48 }
 0x1e1   :  { %v1243_v7 = vpop.f32.mrf.mxu1  ;;  %v6265_v62 = vmul.f32 %v6136_v50, %v6136_v50  ;;  %v4322_v56 = vadd.f32 0.0001, %v6154_v59 }
 0x1e2   :  { %6532 = vst [vmem:[#allocation17_spill] sm:$0xff] %v6168_v6  ;;  %v6172_v9 = vmul.f32 %v1243_v7, %v1243_v7  ;;  %v6174_v11 = vmul.f32 %v1243_v7, %v450_v41  ;;  %v6178_v10 = vadd.f32 %v6166_v3, %v6164_v2 }
 0x1e3   :  { %v5135_v4 = vpop.f32.mrf.mxu1 }
 0x1e4   :  { %6533 = vst [vmem:[#allocation18_spill] sm:$0xff] %v6174_v11  ;;  %v6184_v14 = vadd.f32 %v6172_v9, %v6170_v8  ;;  %v6186_v0 = vmul.f32 %v5135_v4, %v5135_v4  ;;  %v6188_v1 = vmul.f32 %v5135_v4, %v5051_v42  ;;  %v4324_v59 = vadd.f32 0.0001, %v6178_v10 }
 0x1e5   :  { %v1318_v15 = vpop.f32.mrf.mxu1 }
 0x1e6   :  { %6534 = vst [vmem:[#allocation19_spill] sm:$0xff] %v6188_v1  ;;  %v6192_v16 = vadd.f32 %v6186_v0, %v6180_v12  ;;  %v6196_v20 = vmul.f32 %v1318_v15, %v1318_v15  ;;  %v6198_v21 = vmul.f32 %v1318_v15, %v525_v43 }
 0x1e7   :  { %v5142_v22 = vpop.f32.mrf.mxu1 }
 0x1e8   :  { %6535 = vst [vmem:[#allocation20_spill] sm:$0xff] %v6198_v21  ;;  %v6202_v13 = vmul.f32 %v5142_v22, %v5142_v22  ;;  %v6204_v19 = vmul.f32 %v5142_v22, %v5058_v44  ;;  %v6208_v23 = vadd.f32 %v6196_v20, %v6194_v17  ;;  %v6278_v22 = vmul.f32 %v6138_v55, %v6138_v55 }
 0x1e9   :  { %v1393_v24 = vpop.f32.mrf.mxu1 }
 0x1ea   :  { %6536 = vst [vmem:[#allocation21_spill] sm:$0xff] %v6204_v19  ;;  %v6214_v26 = vadd.f32 %v6202_v13, %v6200_v5  ;;  %v6216_v27 = vmul.f32 %v1393_v24, %v1393_v24  ;;  %v6218_v28 = vmul.f32 %v1393_v24, %v600_v45  ;;  %6544 = vst [vmem:[#allocation29_spill] sm:$0xff] %v6278_v22 }
 0x1eb   :  { %v5149_v29 = vpop.f32.mrf.mxu1 }
 0x1ec   :  { %6537 = vst [vmem:[#allocation22_spill] sm:$0xff] %v6218_v28  ;;  %v6222_v30 = vadd.f32 %v6216_v27, %v6210_v25  ;;  %v6226_v32 = vmul.f32 %v5149_v29, %v5149_v29  ;;  %v6228_v33 = vmul.f32 %v5149_v29, %v5065_v46  ;;  %v6256_v46 = vmul.f32 %v6134_v49, %v6134_v49 }
 0x1ed   :  { %v1468_v34 = vpop.f32.mrf.mxu1 }
 0x1ee   :  { %6538 = vst [vmem:[#allocation23_spill] sm:$0xff] %v6228_v33  ;;  %v6232_v36 = vmul.f32 %v1468_v34, %v1468_v34  ;;  %v6234_v37 = vmul.f32 %v1468_v34, %v675_v47  ;;  %v6238_v38 = vadd.f32 %v6226_v32, %v6224_v31 }
 0x1ef   :  { %v5156_v39 = vpop.f32.mrf.mxu1 }
 0x1f0   :  { %6539 = vst [vmem:[#allocation24_spill] sm:$0xff] %v6234_v37  ;;  %v6244_v41 = vadd.f32 %v6232_v36, %v6230_v35  ;;  %v6246_v42 = vmul.f32 %v5156_v39, %v5156_v39  ;;  %v6248_v43 = vmul.f32 %v5156_v39, %v5072_v48  ;;  %v6295_v39 = vmul.f32 %v6140_v51, %v6140_v51 }
 0x1f1   :  { %v1543_v44 = vpop.f32.mrf.mxu1 }
 0x1f2   :  { %6540 = vst [vmem:[#allocation25_spill] sm:$0xff] %v6248_v43  ;;  %v6252_v45 = vadd.f32 %v6246_v42, %v6240_v40  ;;  %v6258_v47 = vmul.f32 %v1543_v44, %v1543_v44  ;;  %v6261_v52 = vmul.f32 %v1543_v44, %v6134_v49  ;;  %6549 = vst [vmem:[#allocation34_spill] sm:$0xff] %v6295_v39 }
 0x1f3   :  { %v5163_v57 = vpop.f32.mrf.mxu1 }
 0x1f4   :  { %6541 = vst [vmem:[#allocation26_spill] sm:$0xff] %v6261_v52  ;;  %v6267_v48 = vmul.f32 %v5163_v57, %v5163_v57  ;;  %v6270_v7 = vmul.f32 %v5163_v57, %v6136_v50  ;;  %v6274_v4 = vadd.f32 %v6258_v47, %v6256_v46  ;;  %v6304_v52 = vmul.f32 %v6142_v18, %v6142_v18 }
 0x1f5   :  { %v1618_v15 = vpop.f32.mrf.mxu1 }
 0x1f6   :  { %6542 = vst [vmem:[#allocation27_spill] sm:$0xff] %v6270_v7  ;;  %6543 = vst [vmem:[#allocation28_spill] sm:$0xff] %v6274_v4  ;;  %v6282_v49 = vadd.f32 %v6267_v48, %v6265_v62  ;;  %v6284_v24 = vmul.f32 %v1618_v15, %v1618_v15  ;;  %v6287_v29 = vmul.f32 %v1618_v15, %v6138_v55  ;;  %v4321_v4 = vadd.f32 0.0001, %v6162_v63 }
 0x1f7   :  { %v5170_v50 = vpop.f32.mrf.mxu1  ;;  %6552 = vst [vmem:[#allocation37_spill] sm:$0xff] %v6304_v52 }
 0x1f8   :  { %6545 = vst [vmem:[#allocation30_spill] sm:$0xff] %v6282_v49  ;;  %6546 = vst [vmem:[#allocation31_spill] sm:$0xff] %v6284_v24  ;;  %v6291_v34 = vadd.f32 %v6284_v24, %v6278_v22  ;;  %v6297_v44 = vmul.f32 %v5170_v50, %v5170_v50  ;;  %v6300_v57 = vmul.f32 %v5170_v50, %v6140_v51 }
 0x1f9   :  { %6547 = vst [vmem:[#allocation32_spill] sm:$0xff] %v6287_v29  ;;  %v1693_v7 = vpop.f32.mrf.mxu1 }
 0x1fa   :  { %6548 = vst [vmem:[#allocation33_spill] sm:$0xff] %v6291_v34  ;;  %6550 = vst [vmem:[#allocation35_spill] sm:$0xff] %v6297_v44  ;;  %v6306_v55 = vmul.f32 %v1693_v7, %v1693_v7  ;;  %v6309_v15 = vmul.f32 %v1693_v7, %v6142_v18  ;;  %v6313_v29 = vadd.f32 %v6297_v44, %v6295_v39 }
 0x1fb   :  { %6551 = vst [vmem:[#allocation36_spill] sm:$0xff] %v6300_v57  ;;  %v5205_v43 = vpop.f32.mrf.mxu1 }
 0x1fc   :  { %6553 = vst [vmem:[#allocation38_spill] sm:$0xff] %v6306_v55  ;;  %6554 = vst [vmem:[#allocation39_spill] sm:$0xff] %v6309_v15  ;;  %v6317_v37 = vadd.f32 %v6306_v55, %v6304_v52  ;;  %v4178_v52 = vsub.f32 %v5205_v43, %v6144_v53 }
 0x1fd   :  { %6555 = vst [vmem:[#allocation40_spill] sm:$0xff] %v6313_v29  ;;  %v1977_v51 = vpop.f32.mrf.mxu1 }
 0x1fe   :  { %6556 = vst [vmem:[#allocation41_spill] sm:$0xff] %v6317_v37  ;;  %v4177_v49 = vsub.f32 %v1977_v51, %v6150_v58 }
 0x1ff   :  { %v5212_v50 = vpop.f32.mrf.mxu1 }
 0x201   :  { %v2052_v57 = vpop.f32.mrf.mxu1 }
 0x202   :  { %v4179_v53 = vsub.f32 %v2052_v57, %v6170_v8 }
 0x203   :  { %v5219_v33 = vpop.f32.mrf.mxu1 }
 0x204   :  { %v4182_v63 = vsub.f32 %v5219_v33, %v6180_v12  ;;  %v4326_v12 = vadd.f32 0.0001, %v6192_v16 }
 0x205   :  { %v2127_v28 = vpop.f32.mrf.mxu1 }
 0x207   :  { %v5226_v19 = vpop.f32.mrf.mxu1 }
 0x209   :  { %v6319_v21 = vpop.f32.mrf.mxu1 }
 0x20b   :  { %v6321_v1 = vpop.f32.mrf.mxu1 }
 0x20d   :  { %v6323_v18 = vpop.f32.mrf.mxu1 }
 0x20f   :  { %v6325_v7 = vpop.f32.mrf.mxu1 }
 0x211   :  { %v6327_v15 = vpop.f32.mrf.mxu1 }
 0x213   :  { %v6329_v29 = vpop.f32.mrf.mxu1 }
 0x215   :  { %v6331_v11 = vpop.f32.mrf.mxu1 }
 0x216   :  { %6557 = vst [vmem:[#allocation42_spill] sm:$0xff] %v6331_v11  ;;  %v4180_v11 = vsub.f32 %v5212_v50, %v6164_v2 }
 0x217   :  { %v6333_v37 = vpop.f32.mrf.mxu1 }
 0x218   :  { %6558 = vst [vmem:[#allocation43_spill] sm:$0xff] %v6333_v37 }
 0x219   :  { %v6335_v55 = vpop.f32.mrf.mxu1 }
 0x21a   :  { %6559 = vst [vmem:[#allocation44_spill] sm:$0xff] %v6335_v55 }
 0x21b   :  { %v5289_v44 = vpop.f32.mrf.mxu1 }
 0x21c   :  { %v4194_v39 = vsub.f32 %v5289_v44, %v6146_v54 }
 0x21d   :  { %v2786_v34 = vpop.f32.mrf.mxu1 }
 0x21e   :  { %v4338_v6 = vadd.f32 %v4194_v39, %v4178_v52  ;;  %v4193_v61 = vsub.f32 %v2786_v34, %v6156_v60 }
 0x21f   :  { %v5296_v24 = vpop.f32.mrf.mxu1 }
 0x220   :  { %v4354_v22 = vadd.f32 0.0009, %v4338_v6  ;;  %v4337_v37 = vadd.f32 %v4193_v61, %v4177_v49  ;;  %v4196_v55 = vsub.f32 %v5296_v24, %v6166_v3  ;;  %v4323_v3 = vadd.f32 0.0001, %v6184_v14 }
 0x221   :  { %v2861_v54 = vpop.f32.mrf.mxu1 }
 0x222   :  { %v6346_v43 = vmul.f32 %v4354_v22, %v4322_v56  ;;  %v4353_v58 = vadd.f32 0.0009, %v4337_v37  ;;  %v4340_v52 = vadd.f32 %v4196_v55, %v4180_v11  ;;  %v4195_v60 = vsub.f32 %v2861_v54, %v6172_v9 }
 0x223   :  { %v5303_v34 = vpop.f32.mrf.mxu1  ;;  %v4181_v56 = vsub.f32 %v2127_v28, %v6194_v17  ;;  %v4183_v28 = vsub.f32 %v6319_v21, %v6210_v25  ;;  %v4327_v21 = vadd.f32 0.0001, %v6222_v30 }
 0x224   :  { %v6350_v39 = vmul.f32 %v4353_v58, %v4321_v4  ;;  %v4356_v2 = vadd.f32 0.0009, %v4340_v52  ;;  %v4339_v61 = vadd.f32 %v4195_v60, %v4179_v53  ;;  %v4198_v6 = vsub.f32 %v5303_v34, %v6186_v0 }
 0x225   :  { %v2936_v8 = vpop.f32.mrf.mxu1  ;;  %v4184_v4 = vsub.f32 %v5226_v19, %v6200_v5  ;;  %v4325_v0 = vadd.f32 0.0001, %v6208_v23  ;;  %v4328_v5 = vadd.f32 0.0001, %v6214_v26  ;;  %v4186_v19 = vsub.f32 %v6321_v1, %v6224_v31 }
 0x226   :  { %v6356_v37 = vmul.f32 %v4356_v2, %v4324_v59  ;;  %v4355_v11 = vadd.f32 0.0009, %v4339_v61  ;;  %v4197_v9 = vsub.f32 %v2936_v8, %v6196_v20  ;;  %v4342_v22 = vadd.f32 %v4198_v6, %v4182_v63  ;;  %v6560_v8 = vld [vmem:[#allocation28_spill] sm:$0xff] }
 0x227   :  { %v5310_v10 = vpop.f32.mrf.mxu1  ;;  %v4330_v26 = vadd.f32 0.0001, %v6238_v38  ;;  %v4185_v1 = vsub.f32 %v6323_v18, %v6230_v35  ;;  %v4188_v52 = vsub.f32 %v6325_v7, %v6240_v40  ;;  %v4187_v2 = vsub.f32 %v6327_v15, %v6256_v46  ;;  %v6561_v15 = vld [vmem:[#allocation29_spill] sm:$0xff] }
 0x228   :  { %v6360_v49 = vmul.f32 %v4355_v11, %v4323_v3  ;;  %v4341_v24 = vadd.f32 %v4197_v9, %v4181_v56  ;;  %v4200_v14 = vsub.f32 %v5310_v10, %v6202_v13  ;;  %v4358_v33 = vadd.f32 0.0009, %v4342_v22  ;;  %v6562_v56 = vld [vmem:[#allocation42_spill] sm:$0xff]  ;;  %v6563_v10 = vld [vmem:[#allocation31_spill] sm:$0xff] }
 0x229   :  { %v3011_v17 = vpop.f32.mrf.mxu1  ;;  %v4332_v18 = vadd.f32 0.0001, %v6252_v45  ;;  %v4190_v3 = vsub.f32 %v6329_v29, %v6265_v62  ;;  %v4331_v46 = vadd.f32 0.0001, %v6560_v8  ;;  %v4189_v11 = vsub.f32 %v6562_v56, %v6561_v15  ;;  %v6564_v29 = vld [vmem:[#allocation15_spill] sm:$0xff]  ;;  %v6579_v15 = vld [vmem:[#allocation20_spill] sm:$0xff] }
 0x22a   :  { %v4357_v44 = vadd.f32 0.0009, %v4341_v24  ;;  %v4344_v20 = vadd.f32 %v4200_v14, %v4184_v4  ;;  %v4199_v57 = vsub.f32 %v3011_v17, %v6216_v27  ;;  %v6371_v55 = vmul.f32 %v4358_v33, %v4326_v12  ;;  %v6565_v24 = vld [vmem:[#allocation16_spill] sm:$0xff]  ;;  %v6566_v14 = vld [vmem:[#allocation17_spill] sm:$0xff]  ;;  %v6578_v8 = vld [vmem:[#allocation19_spill] sm:$0xff] }
 0x22b   :  { %v5317_v13 = vpop.f32.mrf.mxu1  ;;  %5430 = vrcp.f32 %v6346_v43  ;;  %v4226_v4 = vmul.f32 2.0, %v6564_v29  ;;  %v4228_v12 = vmul.f32 2.0, %v6566_v14  ;;  %v4229_v56 = vmul.f32 2.0, %v6579_v15 }
 0x22c   :  { %v6373_v16 = vmul.f32 %v4357_v44, %v4325_v0  ;;  %v4360_v23 = vadd.f32 0.0009, %v4344_v20  ;;  %v4343_v51 = vadd.f32 %v4199_v57, %v4183_v28  ;;  %v4202_v50 = vsub.f32 %v5317_v13, %v6226_v32  ;;  %v6567_v0 = vld [vmem:[#allocation30_spill] sm:$0xff]  ;;  %v6568_v28 = vld [vmem:[#allocation33_spill] sm:$0xff] }
 0x22d   :  { %v3086_v53 = vpop.f32.mrf.mxu1  ;;  %v4334_v33 = vadd.f32 0.0001, %v6567_v0  ;;  %v4333_v43 = vadd.f32 0.0001, %v6568_v28  ;;  %5432 = vrcp.f32 %v6350_v39 }
 0x22e   :  { %v6377_v25 = vmul.f32 %v4360_v23, %v4328_v5  ;;  %v4359_v27 = vadd.f32 0.0009, %v4343_v51  ;;  %v4346_v54 = vadd.f32 %v4202_v50, %v4186_v19  ;;  %v4201_v31 = vsub.f32 %v3086_v53, %v6232_v36  ;;  %v6569_v5 = vld [vmem:[#allocation34_spill] sm:$0xff]  ;;  %v6570_v19 = vld [vmem:[#allocation43_spill] sm:$0xff]  ;;  %v6571_v23 = vld [vmem:[#allocation37_spill] sm:$0xff] }
 0x22f   :  { %v5324_v58 = vpop.f32.mrf.mxu1  ;;  %v4329_v36 = vadd.f32 0.0001, %v6244_v41  ;;  %v4192_v13 = vsub.f32 %v6570_v19, %v6569_v5  ;;  %v6572_v51 = vld [vmem:[#allocation44_spill] sm:$0xff]  ;;  %v6573_v53 = vld [vmem:[#allocation35_spill] sm:$0xff]  ;;  %5434 = vrcp.f32 %v6356_v37 }
 0x230   :  { %v6385_v60 = vmul.f32 %v4359_v27, %v4327_v21  ;;  %v4362_v32 = vadd.f32 0.0009, %v4346_v54  ;;  %v4204_v30 = vsub.f32 %v5324_v58, %v6246_v42  ;;  %v4345_v34 = vadd.f32 %v4201_v31, %v4185_v1  ;;  %v6574_v1 = vld [vmem:[#allocation38_spill] sm:$0xff] }
 0x231   :  { %v3161_v59 = vpop.f32.mrf.mxu1  ;;  %v4191_v50 = vsub.f32 %v6572_v51, %v6571_v23  ;;  %v4242_v58 = vadd.f32 0.0001, %v4226_v4  ;;  %5436 = vrcp.f32 %v6360_v49 }
 0x232   :  { %v6390_v38 = vmul.f32 %v4362_v32, %v4330_v26  ;;  %v4348_v61 = vadd.f32 %v4204_v30, %v4188_v52  ;;  %v4203_v35 = vsub.f32 %v3161_v59, %v6258_v47  ;;  %v4361_v40 = vadd.f32 0.0009, %v4345_v34  ;;  %v6575_v34 = vld [vmem:[#allocation18_spill] sm:$0xff] }
 0x233   :  { %v5331_v7 = vpop.f32.mrf.mxu1  ;;  %v4227_v59 = vmul.f32 2.0, %v6575_v34  ;;  %5438 = vrcp.f32 %v6371_v55 }
 0x234   :  { %v4364_v42 = vadd.f32 0.0009, %v4348_v61  ;;  %v4347_v63 = vadd.f32 %v4203_v35, %v4187_v2  ;;  %v4206_v6 = vsub.f32 %v5331_v7, %v6267_v48  ;;  %v6402_v47 = vmul.f32 %v4361_v40, %v4329_v36  ;;  %v6576_v36 = vld [vmem:[#allocation40_spill] sm:$0xff]  ;;  %v6577_v7 = vld [vmem:[#allocation41_spill] sm:$0xff] }
 0x235   :  { %v3236_v41 = vpop.f32.mrf.mxu1  ;;  %v4225_v48 = vmul.f32 2.0, %v6565_v24  ;;  %v4244_v35 = vadd.f32 0.0001, %v4228_v12  ;;  %5440 = vrcp.f32 %v6373_v16 }
 0x236   :  { %v6404_v45 = vmul.f32 %v4364_v42, %v4332_v18  ;;  %v4363_v9 = vadd.f32 0.0009, %v4347_v63  ;;  %v4350_v22 = vadd.f32 %v4206_v6, %v4190_v3  ;;  %v4205_v62 = vsub.f32 %v3236_v41, %v6563_v10 }
 0x237   :  { %v5338_v17 = vpop.f32.mrf.mxu1  ;;  %v4241_v52 = vadd.f32 0.0001, %v4225_v48  ;;  %v4336_v18 = vadd.f32 0.0001, %v6576_v36  ;;  %v4335_v3 = vadd.f32 0.0001, %v6577_v7  ;;  %5442 = vrcp.f32 %v6377_v25 }
 0x238   :  { %v6412_v44 = vmul.f32 %v4363_v9, %v4331_v46  ;;  %v4366_v20 = vadd.f32 0.0009, %v4350_v22  ;;  %v4349_v57 = vadd.f32 %v4205_v62, %v4189_v11  ;;  %v4208_v21 = vsub.f32 %v5338_v17, %v6573_v53  ;;  %v6581_v48 = vld [vmem:[#allocation22_spill] sm:$0xff]  ;;  %v5431_v0 = vpop.eup %5430 }
 0x239   :  { %v3311_v27 = vpop.f32.mrf.mxu1  ;;  %v4230_v46 = vmul.f32 2.0, %v6578_v8  ;;  %v4243_v62 = vadd.f32 0.0001, %v4227_v59  ;;  %5444 = vrcp.f32 %v6385_v60 }
 0x23a   :  { %v6421_v54 = vmul.f32 %v4366_v20, %v4334_v33  ;;  %v4365_v26 = vadd.f32 0.0009, %v4349_v57  ;;  %v4207_v31 = vsub.f32 %v3311_v27, %v6574_v1  ;;  %v4352_v32 = vadd.f32 %v4208_v21, %v4192_v13  ;;  %v6582_v1 = vld [vmem:[#allocation23_spill] sm:$0xff] }
 0x23b   :  { %v5373_v30 = vpop.f32.mrf.mxu1  ;;  %v4246_v28 = vadd.f32 0.0001, %v4230_v46  ;;  %5446 = vrcp.f32 %v6390_v38 }
 0x23c   :  { %v6425_v2 = vmul.f32 %v4365_v26, %v4333_v43  ;;  %v4351_v61 = vadd.f32 %v4207_v31, %v4191_v50  ;;  %v4210_v39 = vsub.f32 %v5373_v30, %v6564_v29  ;;  %v4368_v37 = vadd.f32 0.0009, %v4352_v32  ;;  %v6580_v29 = vld [vmem:[#allocation21_spill] sm:$0xff]  ;;  %v5433_v50 = vpop.eup %5432 }
 0x23d   :  { %v3595_v40 = vpop.f32.mrf.mxu1  ;;  %v4232_v4 = vmul.f32 2.0, %v6580_v29  ;;  %v4245_v43 = vadd.f32 0.0001, %v4229_v56  ;;  %v5435_v26 = vpop.eup %5434  ;;  %v4234_v31 = vmul.f32 2.0, %v6582_v1  ;;  %5448 = vrcp.f32 %v6402_v47 }
 0x23e   :  { %v4367_v42 = vadd.f32 0.0009, %v4351_v61  ;;  %v4258_v63 = vmul.f32 2.0, %v4210_v39  ;;  %v4209_v6 = vsub.f32 %v3595_v40, %v6565_v24  ;;  %v6435_v11 = vmul.f32 %v4368_v37, %v4336_v18  ;;  %v6583_v61 = vld [vmem:[#allocation24_spill] sm:$0xff]  ;;  %v5437_v37 = vpop.eup %5436 }
 0x23f   :  { %v5380_v41 = vpop.f32.mrf.mxu1  ;;  %v4231_v24 = vmul.f32 2.0, %v6581_v48  ;;  %v4248_v16 = vadd.f32 0.0001, %v4232_v4  ;;  %v4233_v39 = vmul.f32 2.0, %v6583_v61  ;;  %5450 = vrcp.f32 %v6404_v45 }
 0x240   :  { %v6437_v9 = vmul.f32 %v4367_v42, %v4335_v3  ;;  %v4274_v49 = vadd.f32 0.0009, %v4258_v63  ;;  %v4257_v22 = vmul.f32 2.0, %v4209_v6  ;;  %v4212_v10 = vsub.f32 %v5380_v41, %v6566_v14  ;;  %v6584_v42 = vld [vmem:[#allocation25_spill] sm:$0xff]  ;;  %v5439_v45 = vpop.eup %5438 }
 0x241   :  { %v3670_v12 = vpop.f32.mrf.mxu1  ;;  %v4247_v23 = vadd.f32 0.0001, %v4231_v24  ;;  %v4236_v63 = vmul.f32 2.0, %v6584_v42  ;;  %5452 = vrcp.f32 %v6412_v44 }
 0x242   :  { %v4290_v55 = vmul.f32 %v4274_v49, %v4242_v58  ;;  %v4273_v33 = vadd.f32 0.0009, %v4257_v22  ;;  %v4260_v17 = vmul.f32 2.0, %v4212_v10  ;;  %v4211_v14 = vsub.f32 %v3670_v12, %v6575_v34  ;;  %v5441_v4 = vpop.eup %5440 }
 0x243   :  { %v5387_v20 = vpop.f32.mrf.mxu1  ;;  %v4250_v22 = vadd.f32 0.0001, %v4234_v31  ;;  %v4249_v10 = vadd.f32 0.0001, %v4233_v39  ;;  %5454 = vrcp.f32 %v6421_v54 }
 0x244   :  { %v4289_v57 = vmul.f32 %v4273_v33, %v4241_v52  ;;  %v4276_v5 = vadd.f32 0.0009, %v4260_v17  ;;  %v4214_v19 = vsub.f32 %v5387_v20, %v6578_v8  ;;  %v4388_v13 = vmul.f32 %v5431_v0, %v4290_v55  ;;  %v5443_v0 = vpop.eup %5442 }
 0x245   :  { %v4259_v25 = vmul.f32 2.0, %v4211_v14  ;;  %v3745_v51 = vpop.f32.mrf.mxu1  ;;  %v4252_v55 = vadd.f32 0.0001, %v4236_v63  ;;  %5456 = vrcp.f32 %v6425_v2 }
 0x246   :  { %v4292_v53 = vmul.f32 %v4276_v5, %v4244_v35  ;;  %v4262_v21 = vmul.f32 2.0, %v4214_v19  ;;  %v4213_v27 = vsub.f32 %v3745_v51, %v6579_v15  ;;  %v4420_v60 = vsel %vm109_vm0, %v4388_v13, 0.0  ;;  %v6585_v5 = vld [vmem:[#allocation26_spill] sm:$0xff] }
 0x247   :  { %v4275_v58 = vadd.f32 0.0009, %v4259_v25  ;;  %4421 = vadd.xlane.f32.xlu0 %v4420_v60  ;;  %v5394_v52 = vpop.f32.mrf.mxu1  ;;  %v4386_v32 = vmul.f32 %v5433_v50, %v4289_v57  ;;  %v4235_v19 = vmul.f32 2.0, %v6585_v5  ;;  %5458 = vrcp.f32 %v6435_v11 }
 0x248   :  { %v4278_v30 = vadd.f32 0.0009, %v4262_v21  ;;  %v4261_v38 = vmul.f32 2.0, %v4213_v27  ;;  %v4216_v34 = vsub.f32 %v5394_v52, %v6580_v29  ;;  %v4392_v59 = vmul.f32 %v5435_v26, %v4292_v53  ;;  %v6586_v21 = vld [vmem:[#allocation27_spill] sm:$0xff] }
 0x249   :  { %v4291_v35 = vmul.f32 %v4275_v58, %v4243_v62  ;;  %v3820_v36 = vpop.f32.mrf.mxu1  ;;  %v4417_v18 = vsel %vm109_vm0, %v4386_v32, 0.0  ;;  %v4238_v27 = vmul.f32 2.0, %v6586_v21  ;;  %5460 = vrcp.f32 %v6437_v9 }
 0x24a   :  { %v4294_v40 = vmul.f32 %v4278_v30, %v4246_v28  ;;  %v4277_v47 = vadd.f32 0.0009, %v4261_v38  ;;  %v4264_v7 = vmul.f32 2.0, %v4216_v34  ;;  %v4215_v3 = vsub.f32 %v3820_v36, %v6581_v48  ;;  %v6587_v38 = vld [vmem:[#allocation32_spill] sm:$0xff] }
 0x24b   :  { %4418 = vadd.xlane.f32.xlu0 %v4417_v18  ;;  %v4426_v6 = vsel %vm109_vm0, %v4392_v59, 0.0  ;;  %v5401_v8 = vpop.f32.mrf.mxu1  ;;  %v4390_v46 = vmul.f32 %v5437_v37, %v4291_v35  ;;  %v4251_v30 = vadd.f32 0.0001, %v4235_v19  ;;  %v4237_v34 = vmul.f32 2.0, %v6587_v38 }
 0x24c   :  { %v4293_v15 = vmul.f32 %v4277_v47, %v4245_v43  ;;  %v4280_v56 = vadd.f32 0.0009, %v4264_v7  ;;  %v4263_v41 = vmul.f32 2.0, %v4215_v3  ;;  %4427 = vadd.xlane.f32.xlu1 %v4426_v6  ;;  %v4218_v49 = vsub.f32 %v5401_v8, %v6582_v1  ;;  %v5445_v43 = vpop.eup %5444  ;;  %v6588_v47 = vld [vmem:[#allocation36_spill] sm:$0xff] }
 0x24d   :  { %v3895_v62 = vpop.f32.mrf.mxu1  ;;  %v4396_v29 = vmul.f32 %v5439_v45, %v4294_v40  ;;  %v4423_v33 = vsel %vm109_vm0, %v4390_v46, 0.0  ;;  %v5447_v2 = vpop.eup %5446  ;;  %v4254_v40 = vadd.f32 0.0001, %v4238_v27  ;;  %v4240_v7 = vmul.f32 2.0, %v6588_v47 }
 0x24e   :  { %v4296_v44 = vmul.f32 %v4280_v56, %v4248_v16  ;;  %v4279_v48 = vadd.f32 0.0009, %v4263_v41  ;;  %v4266_v24 = vmul.f32 2.0, %v4218_v49  ;;  %v4217_v12 = vsub.f32 %v3895_v62, %v6583_v61  ;;  %v5449_v11 = vpop.eup %5448  ;;  %v6589_v41 = vld [vmem:[#allocation39_spill] sm:$0xff] }
 0x24f   :  { %v5408_v17 = vpop.f32.mrf.mxu1  ;;  %v4394_v28 = vmul.f32 %v5441_v4, %v4293_v15  ;;  %v4432_v60 = vsel %vm109_vm0, %v4396_v29, 0.0  ;;  %v5451_v35 = vpop.eup %5450  ;;  %v4253_v56 = vadd.f32 0.0001, %v4237_v34  ;;  %v4239_v49 = vmul.f32 2.0, %v6589_v41 }
 0x250   :  { %v4295_v14 = vmul.f32 %v4279_v48, %v4247_v23  ;;  %v4282_v20 = vadd.f32 0.0009, %v4266_v24  ;;  %v4265_v54 = vmul.f32 2.0, %v4217_v12  ;;  %4424 = vadd.xlane.f32.xlu1 %v4423_v33  ;;  %v4220_v57 = vsub.f32 %v5408_v17, %v6584_v42  ;;  %v5453_v6 = vpop.eup %5452 }
 0x251   :  { %v4429_v13 = vsel %vm109_vm0, %v4394_v28, 0.0  ;;  %v3970_v16 = vpop.f32.mrf.mxu1  ;;  %v4400_v25 = vmul.f32 %v5443_v0, %v4296_v44  ;;  %v5455_v29 = vpop.eup %5454  ;;  %v4256_v12 = vadd.f32 0.0001, %v4240_v7 }
 0x252   :  { %v4298_v51 = vmul.f32 %v4282_v20, %v4250_v22  ;;  %v4281_v50 = vadd.f32 0.0009, %v4265_v54  ;;  %v4268_v53 = vmul.f32 2.0, %v4220_v57  ;;  %4430 = vadd.xlane.f32.xlu0 %v4429_v13  ;;  %v4219_v23 = vsub.f32 %v3970_v16, %v6585_v5  ;;  %v5457_v33 = vpop.eup %5456 }
 0x253   :  { %v5415_v26 = vpop.f32.mrf.mxu1  ;;  %v4398_v1 = vmul.f32 %v5445_v43, %v4295_v14  ;;  %v4438_v3 = vsel %vm109_vm0, %v4400_v25, 0.0  ;;  %v4255_v57 = vadd.f32 0.0001, %v4239_v49 }
 0x254   :  { %v4297_v31 = vmul.f32 %v4281_v50, %v4249_v10  ;;  %v4284_v58 = vadd.f32 0.0009, %v4268_v53  ;;  %v4267_v52 = vmul.f32 2.0, %v4219_v23  ;;  %4433 = vadd.xlane.f32.xlu1 %v4432_v60  ;;  %v4222_v32 = vsub.f32 %v5415_v26, %v6586_v21  ;;  %v5459_v54 = vpop.eup %5458 }
 0x255   :  { %v4435_v59 = vsel %vm109_vm0, %v4398_v1, 0.0  ;;  %v4045_v61 = vpop.f32.mrf.mxu1  ;;  %v4404_v39 = vmul.f32 %v5447_v2, %v4298_v51 }
 0x256   :  { %v4300_v9 = vmul.f32 %v4284_v58, %v4252_v55  ;;  %v4283_v36 = vadd.f32 0.0009, %v4267_v52  ;;  %v4270_v18 = vmul.f32 2.0, %v4222_v32  ;;  %4436 = vadd.xlane.f32.xlu0 %v4435_v59  ;;  %v4221_v37 = vsub.f32 %v4045_v61, %v6587_v38  ;;  %v5461_v25 = vpop.eup %5460 }
 0x257   :  { %v5422_v42 = vpop.f32.mrf.mxu1  ;;  %v4402_v63 = vmul.f32 %v5449_v11, %v4297_v31  ;;  %v4444_v0 = vsel %vm109_vm0, %v4404_v39, 0.0  ;;  %v4481_v31 = vlaneseq }
 0x258   :  { %v4299_v8 = vmul.f32 %v4283_v36, %v4251_v30  ;;  %v4286_v46 = vadd.f32 0.0009, %v4270_v18  ;;  %v4269_v45 = vmul.f32 2.0, %v4221_v37  ;;  %4439 = vadd.xlane.f32.xlu1 %v4438_v3  ;;  %v4224_v15 = vsub.f32 %v5422_v42, %v6588_v47 }
 0x259   :  { %v4441_v22 = vsel %vm109_vm0, %v4402_v63, 0.0  ;;  %v4120_v10 = vpop.f32.mrf.mxu1  ;;  %v4408_v62 = vmul.f32 %v5451_v35, %v4300_v9  ;;  %v4482_v32 = vand.u32 127, %v4481_v31  ;;  %v4484_v34 = vshrl.u32 %v4481_v31, 7 }
 0x25a   :  { %v4302_v4 = vmul.f32 %v4286_v46, %v4254_v40  ;;  %v4285_v44 = vadd.f32 0.0009, %v4269_v45  ;;  %v4272_v48 = vmul.f32 2.0, %v4224_v15  ;;  %4442 = vadd.xlane.f32.xlu0 %v4441_v22  ;;  %v4223_v24 = vsub.f32 %v4120_v10, %v6589_v41 }
 0x25b   :  { %v4406_v55 = vmul.f32 %v5453_v6, %v4299_v8  ;;  %v4450_v16 = vsel %vm109_vm0, %v4408_v62, 0.0  ;;  %v4487_v59 = vadd.s32 4294967288, %v4482_v32  ;;  %v4485_v35 = vsub.s32 %v4482_v32, %v4484_v34 }
 0x25c   :  { %v4301_v17 = vmul.f32 %v4285_v44, %v4253_v56  ;;  %v4288_v28 = vadd.f32 0.0009, %v4272_v48  ;;  %v4271_v43 = vmul.f32 2.0, %v4223_v24  ;;  %4445 = vadd.xlane.f32.xlu1 %v4444_v0  ;;  %v4412_v14 = vmul.f32 %v5455_v29, %v4302_v4 }
 0x25d   :  { %v4447_v20 = vsel %vm109_vm0, %v4406_v55, 0.0  ;;  %v4490_v9 = vsub.s32 %v4487_v59, %v4484_v34 }
 0x25e   :  { %v4304_v5 = vmul.f32 %v4288_v28, %v4256_v12  ;;  %v4287_v19 = vadd.f32 0.0009, %v4271_v43  ;;  %4448 = vadd.xlane.f32.xlu0 %v4447_v20  ;;  %v4410_v13 = vmul.f32 %v5457_v33, %v4301_v17  ;;  %v4456_v23 = vsel %vm109_vm0, %v4412_v14, 0.0 }
 0x260   :  { %v4303_v2 = vmul.f32 %v4287_v19, %v4255_v57  ;;  %4451 = vadd.xlane.f32.xlu1 %v4450_v16  ;;  %v4453_v51 = vsel %vm109_vm0, %v4410_v13, 0.0  ;;  %v4416_v50 = vmul.f32 %v5459_v54, %v4304_v5 }
 0x262   :  { %4454 = vadd.xlane.f32.xlu0 %v4453_v51  ;;  %v4414_v53 = vmul.f32 %v5461_v25, %v4303_v2  ;;  %v4462_v27 = vsel %vm109_vm0, %v4416_v50, 0.0 }
 0x264   :  { %4457 = vadd.xlane.f32.xlu1 %v4456_v23  ;;  %v4459_v21 = vsel %vm109_vm0, %v4414_v53, 0.0 }
 0x266   :  { %4460 = vadd.xlane.f32.xlu0 %v4459_v21 }
 0x268   :  { %4463 = vadd.xlane.f32.xlu1 %v4462_v27 }
 0x2d0   :  { %v4422_v60 = vpop.xlane.xlu0 %4421 }
 0x2d1   :  { %v4491_v8 = vrot.slane %v4422_v60, %v4490_v9 }
 0x2d4   :  { %v4419_v1 = vpop.xlane.xlu0 %4418 }
 0x2d5   :  { %v4428_v26 = vpop.xlane.xlu1 %4427  ;;  %v4486_v47 = vrot.slane %v4419_v1, %v4485_v35 }
 0x2d6   :  { %v4501_v7 = vrot.slane %v4428_v26, %v4490_v9 }
 0x2d7   :  { %v4493_v22 = vsel %vm4492_vm1, %v4491_v8, %v4486_v47 }
 0x2d9   :  { %v4425_v11 = vpop.xlane.xlu1 %4424 }
 0x2da   :  { %v4497_v18 = vrot.slane %v4425_v11, %v4485_v35 }
 0x2db   :  { %v4431_v58 = vpop.xlane.xlu0 %4430 }
 0x2dc   :  { %v4506_v42 = vrot.slane %v4431_v58, %v4485_v35  ;;  %v4502_v46 = vsel %vm4492_vm1, %v4501_v7, %v4497_v18 }
 0x2dd   :  { %v4434_v52 = vpop.xlane.xlu1 %4433  ;;  %v4558_v4 = vsel %vm4557_vm2, %v4502_v46, %v4493_v22 }
 0x2de   :  { %v4510_v37 = vrot.slane %v4434_v52, %v4490_v9 }
 0x2df   :  { %v4437_v30 = vpop.xlane.xlu0 %4436 }
 0x2e0   :  { %v4515_v45 = vrot.slane %v4437_v30, %v4485_v35  ;;  %v4511_v56 = vsel %vm4492_vm1, %v4510_v37, %v4506_v42 }
 0x2e1   :  { %v4440_v38 = vpop.xlane.xlu1 %4439  ;;  %v4560_v12 = vsel %vm4559_vm3, %v4511_v56, %v4558_v4 }
 0x2e2   :  { %v4519_v3 = vrot.slane %v4440_v38, %v4490_v9 }
 0x2e3   :  { %v4443_v61 = vpop.xlane.xlu0 %4442 }
 0x2e4   :  { %v4524_v41 = vrot.slane %v4443_v61, %v4485_v35  ;;  %v4520_v10 = vsel %vm4492_vm1, %v4519_v3, %v4515_v45 }
 0x2e5   :  { %v4446_v39 = vpop.xlane.xlu1 %4445  ;;  %v4562_v55 = vsel %vm4561_vm4, %v4520_v10, %v4560_v12 }
 0x2e6   :  { %v4528_v63 = vrot.slane %v4446_v39, %v4490_v9 }
 0x2e7   :  { %v4449_v36 = vpop.xlane.xlu0 %4448 }
 0x2e8   :  { %v4533_v62 = vrot.slane %v4449_v36, %v4485_v35  ;;  %v4529_v44 = vsel %vm4492_vm1, %v4528_v63, %v4524_v41 }
 0x2e9   :  { %v4452_v40 = vpop.xlane.xlu1 %4451  ;;  %v4564_v28 = vsel %vm4563_vm5, %v4529_v44, %v4562_v55 }
 0x2ea   :  { %v4537_v15 = vrot.slane %v4452_v40, %v4490_v9 }
 0x2eb   :  { %v4455_v6 = vpop.xlane.xlu0 %4454 }
 0x2ec   :  { %v4542_v48 = vrot.slane %v4455_v6, %v4485_v35  ;;  %v4538_v0 = vsel %vm4492_vm1, %v4537_v15, %v4533_v62 }
 0x2ed   :  { %v4458_v49 = vpop.xlane.xlu1 %4457  ;;  %v4566_v20 = vsel %vm4565_vm6, %v4538_v0, %v4564_v28 }
 0x2ee   :  { %v4546_v29 = vrot.slane %v4458_v49, %v4490_v9 }
 0x2ef   :  { %v4461_v24 = vpop.xlane.xlu0 %4460 }
 0x2f0   :  { %v4547_v33 = vsel %vm4492_vm1, %v4546_v29, %v4542_v48  ;;  %v4551_v43 = vrot.slane %v4461_v24, %v4485_v35 }
 0x2f1   :  { %v4464_v17 = vpop.xlane.xlu1 %4463  ;;  %v4568_v57 = vsel %vm4567_vm7, %v4547_v33, %v4566_v20 }
 0x2f2   :  { %v4555_v14 = vrot.slane %v4464_v17, %v4490_v9 }
 0x2f4   :  { %v4556_v54 = vsel %vm4492_vm1, %v4555_v14, %v4551_v43 }
 0x2f5   :  { %v4570_v5 = vsel %vm4569_vm8, %v4556_v54, %v4568_v57 }
 0x2f6   :  { %v4572_v19 = vsel %vm109_vm0, %v4570_v5, 0.0 }
 0x2f7   :  { %4573 = vadd.xlane.f32.xlu0 %v4572_v19 }
 0x380   :  { %v4574_v13 = vpop.xlane.xlu0 %4573 }
 0x381   :  { %4575 = vst [vmem:[#allocation10] sm:$0xff] %v4574_v13 }
 0x382   :  { %5553 = shalt.err (!%p5550_p10)
}
 0x383   :  { %4585 = dma.vmem_to_hbm [thread:$0]  %s4583_s3, 128, %s6507_s4, [#allocation4]  }
 0x384   :  { %5568 = dma.done.wait [#allocation4], 128  }
 0x385   :  { %5569 = vsyncadd [#allocation4], 4294967168 }
 0x386   :  { %4589 = vsyncpa [#allocation3], 1 }
 0x387   :  { %4590 = vsyncpa [#allocation6], 1 }
 0x388   :  { %4591 = vsyncpa [#allocation9], 1 }
 0x389   :  { %4592 = vsyncpa [#allocation4], 1 }

</bundles_post_ra>
